<compile_context>
chip_gen: v7x
topology: tpu7x:2x2x1
jax: 0.10.0
libtpu: 0.0.40
codegen_flags: <defaults>
</compile_context>

<pallas_src>
import functools

import jax
import jax.numpy as jnp
from jax.experimental import pallas as pl
from jax.experimental.pallas import tpu as pltpu

# ----------------------------- config -----------------------------
VOCAB = 128
HIDDEN = 32
N_HEADS = 2
HEAD_DIM = HIDDEN // N_HEADS
INTER = 64
N_LAYERS = 2
MAX_POS = 16
LN_EPS = 1e-12
IGNORE_INDEX = -100
LANE = 128                      # TPU lane width; q/k/v each padded to one lane group

# small-parameter slab row layout (all rows are 128 lanes, f32)
_EMB_G, _EMB_B, _PRED_B, _PRED_LN_G, _PRED_LN_B, _DEC_B = range(6)
_GLOBAL_ROWS = 6
_ROWS_PER_LAYER = 10
_QB, _KB, _VB, _OB, _LN1G, _LN1B, _IB, _FB, _LN2G, _LN2B = range(_ROWS_PER_LAYER)
_W_PER_LAYER = 4                # qkv_w (fused+padded), o_w (padded), i_w, f_w


# ----------------------------- fused kernel -----------------------------
def _layernorm(x, g, b):
    mu = jnp.mean(x, axis=-1, keepdims=True)
    var = jnp.mean((x - mu) ** 2, axis=-1, keepdims=True)
    return (x - mu) * jax.lax.rsqrt(var + LN_EPS) * g + b


def _bert_fused_kernel(*refs, seq, n_layers):
    n_w = _W_PER_LAYER * n_layers
    x_ref, labels_ref, slab_ref = refs[0], refs[1], refs[2]
    w_refs = refs[3:3 + n_w]
    pred_w_ref = refs[3 + n_w]
    wemb_t_ref = refs[4 + n_w]
    logits_ref = refs[5 + n_w]
    stats_ref = refs[6 + n_w]

    scale = 1.0 / float(HEAD_DIM) ** 0.5

    def vec(row, width):
        # offset-0 lane window on the packed small-param slab (no relayout)
        return slab_ref[row:row + 1, :width]

    # hoisted per-head lane masks over the 128-lane-padded q/k/v groups
    lane_idx = jax.lax.broadcasted_iota(jnp.int32, (1, LANE), 1)
    head_mask = [
        ((lane_idx >= h * HEAD_DIM) & (lane_idx < (h + 1) * HEAD_DIM)).astype(jnp.float32)
        for h in range(N_HEADS)
    ]
    q_head_mask = [m * scale for m in head_mask]     # fold 1/sqrt(d) into the q mask

    # ---- embeddings LayerNorm (gather + pos/type add are XLA glue) ----
    x = _layernorm(x_ref[...], vec(_EMB_G, HIDDEN), vec(_EMB_B, HIDDEN))   # (S, H) f32

    # ---- encoder layers (static unroll; activations never leave VMEM/vregs) ----
    for li in range(n_layers):
        qkv_w, o_w, i_w, f_w = w_refs[li * _W_PER_LAYER:(li + 1) * _W_PER_LAYER]
        base = _GLOBAL_ROWS + li * _ROWS_PER_LAYER

        # fused QKV projection: one bf16 MXU push, N = 3*128 (lane-padded)
        qkv = jnp.dot(x.astype(jnp.bfloat16), qkv_w[...],
                      preferred_element_type=jnp.float32)                   # (S, 384)
        # 128-aligned, 128-wide slices: pure vreg selection, no XLU relayout
        q = qkv[:, 0 * LANE:1 * LANE] + vec(base + _QB, LANE)               # (S, 128)
        k = qkv[:, 1 * LANE:2 * LANE] + vec(base + _KB, LANE)
        v = qkv[:, 2 * LANE:3 * LANE] + vec(base + _VB, LANE)
        k_b16 = k.astype(jnp.bfloat16)

        # multi-head attention via lane masks; contexts land in their own lanes
        attn_ctx = None
        for h in range(N_HEADS):
            qh = (q * q_head_mask[h]).astype(jnp.bfloat16)                  # head-h lanes only
            s = jax.lax.dot_general(qh, k_b16, (((1,), (1,)), ((), ())),
                                    preferred_element_type=jnp.float32)     # (S, S), pre-scaled
            m = jnp.max(s, axis=-1, keepdims=True)
            p = jnp.exp(s - m)
            p = p * pl.reciprocal(jnp.sum(p, axis=-1, keepdims=True), approx=True)
            vh = (v * head_mask[h]).astype(jnp.bfloat16)
            ctx = jnp.dot(p.astype(jnp.bfloat16), vh,
                          preferred_element_type=jnp.float32)               # (S, 128)
            attn_ctx = ctx if attn_ctx is None else attn_ctx + ctx

        # single output projection (o_w zero-padded to 128 rows in the wrapper)
        attn_out = jnp.dot(attn_ctx.astype(jnp.bfloat16), o_w[...],
                           preferred_element_type=jnp.float32) + vec(base + _OB, HIDDEN)
        x = _layernorm(attn_out + x, vec(base + _LN1G, HIDDEN), vec(base + _LN1B, HIDDEN))

        # TODO(synk): HF BERT uses exact (erf) GELU; tanh approximation kept for
        # safe Mosaic lowering.
        inter = jax.nn.gelu(
            jnp.dot(x.astype(jnp.bfloat16), i_w[...], preferred_element_type=jnp.float32)
            + vec(base + _IB, INTER), approximate=True)
        ffn = jnp.dot(inter.astype(jnp.bfloat16), f_w[...],
                      preferred_element_type=jnp.float32) + vec(base + _FB, HIDDEN)
        x = _layernorm(ffn + x, vec(base + _LN2G, HIDDEN), vec(base + _LN2B, HIDDEN))

    # ---- MLM head: transform + LayerNorm + tied decoder (plain matmul, wemb pre-transposed) ----
    h = jax.nn.gelu(
        jnp.dot(x.astype(jnp.bfloat16), pred_w_ref[...], preferred_element_type=jnp.float32)
        + vec(_PRED_B, HIDDEN), approximate=True)
    h = _layernorm(h, vec(_PRED_LN_G, HIDDEN), vec(_PRED_LN_B, HIDDEN))
    logits = jnp.dot(h.astype(jnp.bfloat16), wemb_t_ref[...],
                     preferred_element_type=jnp.float32) + vec(_DEC_B, VOCAB)  # (S, 128)
    logits_ref[...] = logits                                                # lane-dense store

    # ---- per-sequence masked-LM cross-entropy partials (finalized in XLA) ----
    lab = labels_ref[...]                                                   # (S, 1) int32
    lmax = jnp.max(logits, axis=-1, keepdims=True)
    lse = jnp.log(jnp.sum(jnp.exp(logits - lmax), axis=-1, keepdims=True)) + lmax
    vocab_iota = jax.lax.broadcasted_iota(jnp.int32, (seq, VOCAB), 1)
    correct = jnp.sum(jnp.where(vocab_iota == lab, logits, 0.0), axis=-1, keepdims=True)
    valid = (lab != IGNORE_INDEX).astype(jnp.float32)
    loss_sum = jnp.sum((lse - correct) * valid)
    count = jnp.sum(valid)
    out_lane = jax.lax.broadcasted_iota(jnp.int32, (8, LANE), 1)
    stats_ref[...] = jnp.where(out_lane == 0, loss_sum,
                               jnp.where(out_lane == 1, count, 0.0))


# ----------------------------- parameters -----------------------------
def init_params(key):
    def nrm(k, shape):
        return (0.02 * jax.random.normal(k, shape)).astype(jnp.float32)

    keys = iter(jax.random.split(key, 80))
    params = {
        "word_emb": nrm(next(keys), (VOCAB, HIDDEN)),
        "pos_emb": nrm(next(keys), (MAX_POS, HIDDEN)),
        "type_emb": nrm(next(keys), (2, HIDDEN)),
        "emb_ln_g": jnp.ones((HIDDEN,), jnp.float32),
        "emb_ln_b": jnp.zeros((HIDDEN,), jnp.float32),
        "layers": [],
        "pred_w": nrm(next(keys), (HIDDEN, HIDDEN)),
        "pred_b": jnp.zeros((HIDDEN,), jnp.float32),
        "pred_ln_g": jnp.ones((HIDDEN,), jnp.float32),
        "pred_ln_b": jnp.zeros((HIDDEN,), jnp.float32),
        "dec_b": jnp.zeros((VOCAB,), jnp.float32),
    }
    for _ in range(N_LAYERS):
        params["layers"].append({
            "q_w": nrm(next(keys), (HIDDEN, HIDDEN)), "q_b": jnp.zeros((HIDDEN,), jnp.float32),
            "k_w": nrm(next(keys), (HIDDEN, HIDDEN)), "k_b": jnp.zeros((HIDDEN,), jnp.float32),
            "v_w": nrm(next(keys), (HIDDEN, HIDDEN)), "v_b": jnp.zeros((HIDDEN,), jnp.float32),
            "o_w": nrm(next(keys), (HIDDEN, HIDDEN)), "o_b": jnp.zeros((HIDDEN,), jnp.float32),
            "ln1_g": jnp.ones((HIDDEN,), jnp.float32), "ln1_b": jnp.zeros((HIDDEN,), jnp.float32),
            "i_w": nrm(next(keys), (HIDDEN, INTER)), "i_b": jnp.zeros((INTER,), jnp.float32),
            "f_w": nrm(next(keys), (INTER, HIDDEN)), "f_b": jnp.zeros((HIDDEN,), jnp.float32),
            "ln2_g": jnp.ones((HIDDEN,), jnp.float32), "ln2_b": jnp.zeros((HIDDEN,), jnp.float32),
        })
    return params


# ----------------------------- wrapper-side layout plumbing -----------------------------
def _row(v):
    v = v.astype(jnp.float32)
    return jnp.pad(v, (0, LANE - v.shape[0]))[None, :]


def _pad_cols(w, total):
    return jnp.pad(w, ((0, 0), (0, total - w.shape[1])))


def _pad_rows(w, total):
    return jnp.pad(w, ((0, total - w.shape[0]), (0, 0)))


# ----------------------------- forward -----------------------------
def bert_lm_pred_forward(params, input_ids, labels=None):
    """Mirrors BertForMaskedLM.forward(input_ids, labels) -> (loss, logits)."""
    b, s = input_ids.shape
    n_layers = len(params["layers"])

    # embedding lookup (gather) + position/type add: XLA glue, done once, f32
    x = (jnp.take(params["word_emb"], input_ids, axis=0)
         + params["pos_emb"][:s][None, :, :]
         + params["type_emb"][0][None, None, :]).astype(jnp.float32)        # (B, S, H)

    if labels is None:
        labels3 = jnp.full((b, s, 1), IGNORE_INDEX, dtype=jnp.int32)
    else:
        labels3 = labels.reshape(b, s, 1).astype(jnp.int32)

    # pack all tiny bias/gamma/beta vectors into ONE (R, 128) f32 slab (one DMA)
    rows = [_row(params["emb_ln_g"]), _row(params["emb_ln_b"]),
            _row(params["pred_b"]), _row(params["pred_ln_g"]),
            _row(params["pred_ln_b"]), _row(params["dec_b"])]
    for layer in params["layers"]:
        rows += [_row(layer["q_b"]), _row(layer["k_b"]), _row(layer["v_b"]),
                 _row(layer["o_b"]), _row(layer["ln1_g"]), _row(layer["ln1_b"]),
                 _row(layer["i_b"]), _row(layer["f_b"]),
                 _row(layer["ln2_g"]), _row(layer["ln2_b"])]
    slab = jnp.concatenate(rows, axis=0)                                     # (6+10L, 128)

    # MXU weights: bf16; QKV fused + lane-padded so q/k/v each own a 128-lane group;
    # o_w zero-padded to 128 rows; word_emb pre-transposed for the tied decoder.
    w_args = []
    for layer in params["layers"]:
        qkv_w = jnp.concatenate([_pad_cols(layer["q_w"], LANE),
                                 _pad_cols(layer["k_w"], LANE),
                                 _pad_cols(layer["v_w"], LANE)], axis=1)     # (H, 384)
        o_w = _pad_rows(layer["o_w"], LANE)                                   # (128, H)
        w_args += [qkv_w.astype(jnp.bfloat16), o_w.astype(jnp.bfloat16),
                   layer["i_w"].astype(jnp.bfloat16), layer["f_w"].astype(jnp.bfloat16)]
    pred_w = params["pred_w"].astype(jnp.bfloat16)                            # (H, H)
    wemb_t = params["word_emb"].T.astype(jnp.bfloat16)                        # (H, VOCAB)

    args = [x, labels3, slab] + w_args + [pred_w, wemb_t]

    def full_spec(a):
        return pl.BlockSpec(a.shape, lambda i: (0,) * a.ndim)

    in_specs = ([pl.BlockSpec((None, s, HIDDEN), lambda i: (i, 0, 0)),
                 pl.BlockSpec((None, s, 1), lambda i: (i, 0, 0)),
                 full_spec(slab)]
                + [full_spec(w) for w in w_args]
                + [full_spec(pred_w), full_spec(wemb_t)])

    out_shape = (jax.ShapeDtypeStruct((b, s, VOCAB), jnp.float32),
                 jax.ShapeDtypeStruct((b, 8, LANE), jnp.float32))
    out_specs = (pl.BlockSpec((None, s, VOCAB), lambda i: (i, 0, 0)),
                 pl.BlockSpec((None, 8, LANE), lambda i: (i, 0, 0)))

    # advisory cost estimate so XLA schedules the gather glue against the fused call
    per_layer_mm = ([(s, HIDDEN, 3 * LANE)]
                    + [(s, LANE, s), (s, s, LANE)] * N_HEADS
                    + [(s, LANE, HIDDEN), (s, HIDDEN, INTER), (s, INTER, HIDDEN)])
    head_mm = [(s, HIDDEN, HIDDEN), (s, HIDDEN, VOCAB)]
    flops = b * (n_layers * sum(2 * m * k * n for m, k, n in per_layer_mm)
                 + sum(2 * m * k * n for m, k, n in head_mm))
    transcendentals = b * (n_layers * (N_HEADS * s * s + s * INTER)
                           + s * HIDDEN + 2 * s * VOCAB)
    bytes_accessed = (sum(int(v.size) * v.dtype.itemsize for v in args)
                      + b * s * VOCAB * 4 + b * 8 * LANE * 4)

    kernel = functools.partial(_bert_fused_kernel, seq=s, n_layers=n_layers)
    logits, stats = pl.pallas_call(
        kernel,
        grid=(b,),                       # one sequence per grid step (2 TCs on v7x)
        in_specs=in_specs,
        out_specs=out_specs,
        out_shape=out_shape,
        compiler_params=pltpu.CompilerParams(dimension_semantics=("parallel",)),
        cost_estimate=pl.CostEstimate(flops=flops,
                                      transcendentals=transcendentals,
                                      bytes_accessed=bytes_accessed),
    )(*args)

    if labels is None:
        return None, logits
    loss = jnp.sum(stats[:, 0, 0]) / jnp.maximum(jnp.sum(stats[:, 0, 1]), 1.0)
    return loss, logits


# ----------------------------- main -----------------------------
if __name__ == "__main__":
    key = jax.random.PRNGKey(0)
    k_params, k_ids, k_labels, k_mask = jax.random.split(key, 4)

    B, S = 2, 8
    params = init_params(k_params)
    input_ids = jax.random.randint(k_ids, (B, S), 0, VOCAB, dtype=jnp.int32)
    labels = jax.random.randint(k_labels, (B, S), 0, VOCAB, dtype=jnp.int32)
    # mimic MLM: only ~25% of positions carry a label, the rest are -100
    masked = jax.random.uniform(k_mask, (B, S)) < 0.25
    labels = jnp.where(masked, labels, IGNORE_INDEX)

    fwd = jax.jit(bert_lm_pred_forward)
    loss, logits = fwd(params, input_ids, labels)
    loss = jax.block_until_ready(loss)
    logits = jax.block_until_ready(logits)

    assert logits.shape == (B, S, VOCAB)
    assert bool(jnp.isfinite(loss)) and bool(jnp.all(jnp.isfinite(logits)))
    print("KERNEL_OK")
</pallas_src>

<mosaic_0001>
module attributes {stable_mosaic.version = 11 : i64} {
  func.func @_bert_fused_kernel(%arg0: i32, %arg1: memref<1x8x32xf32, #tpu.memory_space<vmem>>, %arg2: memref<1x8x1xi32, #tpu.memory_space<vmem>>, %arg3: memref<26x128xf32, #tpu.memory_space<vmem>>, %arg4: memref<32x384xbf16, #tpu.memory_space<vmem>>, %arg5: memref<128x32xbf16, #tpu.memory_space<vmem>>, %arg6: memref<32x64xbf16, #tpu.memory_space<vmem>>, %arg7: memref<64x32xbf16, #tpu.memory_space<vmem>>, %arg8: memref<32x384xbf16, #tpu.memory_space<vmem>>, %arg9: memref<128x32xbf16, #tpu.memory_space<vmem>>, %arg10: memref<32x64xbf16, #tpu.memory_space<vmem>>, %arg11: memref<64x32xbf16, #tpu.memory_space<vmem>>, %arg12: memref<32x32xbf16, #tpu.memory_space<vmem>>, %arg13: memref<32x128xbf16, #tpu.memory_space<vmem>>, %arg14: memref<1x8x128xf32, #tpu.memory_space<vmem>>, %arg15: memref<1x8x128xf32, #tpu.memory_space<vmem>>) attributes {dimension_semantics = [#tpu.dimension_semantics<parallel>], iteration_bounds = array<i64: 2>, scalar_prefetch = 0 : i64, scratch_operands = 0 : i64, tpu.core_type = #tpu.core_type<tc>, window_params = [{transform_indices = @transform_0, window_bounds = array<i64: 1, 8, 32>}, {transform_indices = @transform_1, window_bounds = array<i64: 1, 8, 1>}, {pipeline_mode = #tpu.pipeline_mode<synchronous>, transform_indices = @transform_2, window_bounds = array<i64: 26, 128>}, {pipeline_mode = #tpu.pipeline_mode<synchronous>, transform_indices = @transform_3, window_bounds = array<i64: 32, 384>}, {pipeline_mode = #tpu.pipeline_mode<synchronous>, transform_indices = @transform_4, window_bounds = array<i64: 128, 32>}, {pipeline_mode = #tpu.pipeline_mode<synchronous>, transform_indices = @transform_5, window_bounds = array<i64: 32, 64>}, {pipeline_mode = #tpu.pipeline_mode<synchronous>, transform_indices = @transform_6, window_bounds = array<i64: 64, 32>}, {pipeline_mode = #tpu.pipeline_mode<synchronous>, transform_indices = @transform_7, window_bounds = array<i64: 32, 384>}, {pipeline_mode = #tpu.pipeline_mode<synchronous>, transform_indices = @transform_8, window_bounds = array<i64: 128, 32>}, {pipeline_mode = #tpu.pipeline_mode<synchronous>, transform_indices = @transform_9, window_bounds = array<i64: 32, 64>}, {pipeline_mode = #tpu.pipeline_mode<synchronous>, transform_indices = @transform_10, window_bounds = array<i64: 64, 32>}, {pipeline_mode = #tpu.pipeline_mode<synchronous>, transform_indices = @transform_11, window_bounds = array<i64: 32, 32>}, {pipeline_mode = #tpu.pipeline_mode<synchronous>, transform_indices = @transform_12, window_bounds = array<i64: 32, 128>}, {transform_indices = @transform_13, window_bounds = array<i64: 1, 8, 128>}, {transform_indices = @transform_14, window_bounds = array<i64: 1, 8, 128>}]} {
    %0 = tpu.iota {dimensions = array<i32: 1>} : vector<1x128xi32>
    %c0_i32 = arith.constant 0 : i32
    %1 = vector.broadcast %c0_i32 : i32 to vector<1x128xi32>
    %2 = arith.cmpi sge, %0, %1 : vector<1x128xi32>
    %c16_i32 = arith.constant 16 : i32
    %3 = vector.broadcast %c16_i32 : i32 to vector<1x128xi32>
    %4 = arith.cmpi slt, %0, %3 : vector<1x128xi32>
    %5 = arith.andi %2, %4 : vector<1x128xi1>
    %6 = arith.extui %5 : vector<1x128xi1> to vector<1x128xi32>
    %7 = arith.sitofp %6 : vector<1x128xi32> to vector<1x128xf32>
    %c16_i32_0 = arith.constant 16 : i32
    %8 = vector.broadcast %c16_i32_0 : i32 to vector<1x128xi32>
    %9 = arith.cmpi sge, %0, %8 : vector<1x128xi32>
    %c32_i32 = arith.constant 32 : i32
    %10 = vector.broadcast %c32_i32 : i32 to vector<1x128xi32>
    %11 = arith.cmpi slt, %0, %10 : vector<1x128xi32>
    %12 = arith.andi %9, %11 : vector<1x128xi1>
    %13 = arith.extui %12 : vector<1x128xi1> to vector<1x128xi32>
    %14 = arith.sitofp %13 : vector<1x128xi32> to vector<1x128xf32>
    %cst = arith.constant 2.500000e-01 : f32
    %15 = vector.broadcast %cst : f32 to vector<1x128xf32>
    %16 = arith.mulf %7, %15 : vector<1x128xf32>
    %cst_1 = arith.constant 2.500000e-01 : f32
    %17 = vector.broadcast %cst_1 : f32 to vector<1x128xf32>
    %18 = arith.mulf %14, %17 : vector<1x128xf32>
    %c0 = arith.constant 0 : index
    %c0_2 = arith.constant 0 : index
    %c0_3 = arith.constant 0 : index
    %19 = vector.load %arg1[%c0, %c0_2, %c0_3] : memref<1x8x32xf32, #tpu.memory_space<vmem>>, vector<1x8x32xf32>
    %20 = vector.shape_cast %19 : vector<1x8x32xf32> to vector<8x32xf32>
    %c0_4 = arith.constant 0 : index
    %c0_5 = arith.constant 0 : index
    %21 = vector.load %arg3[%c0_4, %c0_5] : memref<26x128xf32, #tpu.memory_space<vmem>>, vector<1x32xf32>
    %c1 = arith.constant 1 : index
    %c0_6 = arith.constant 0 : index
    %22 = vector.load %arg3[%c1, %c0_6] : memref<26x128xf32, #tpu.memory_space<vmem>>, vector<1x32xf32>
    %cst_7 = arith.constant dense<0.000000e+00> : vector<8xf32>
    %23 = vector.multi_reduction <add>, %20, %cst_7 [1] : vector<8x32xf32> to vector<8xf32>
    %24 = vector.shape_cast %23 : vector<8xf32> to vector<8x1xf32>
    %cst_8 = arith.constant 3.200000e+01 : f32
    %25 = vector.broadcast %cst_8 : f32 to vector<8x1xf32>
    %26 = arith.divf %24, %25 : vector<8x1xf32>
    %27 = vector.broadcast %26 : vector<8x1xf32> to vector<8x32xf32>
    %28 = arith.subf %20, %27 : vector<8x32xf32>
    %29 = arith.mulf %28, %28 : vector<8x32xf32>
    %cst_9 = arith.constant dense<0.000000e+00> : vector<8xf32>
    %30 = vector.multi_reduction <add>, %29, %cst_9 [1] : vector<8x32xf32> to vector<8xf32>
    %31 = vector.shape_cast %30 : vector<8xf32> to vector<8x1xf32>
    %cst_10 = arith.constant 3.200000e+01 : f32
    %32 = vector.broadcast %cst_10 : f32 to vector<8x1xf32>
    %33 = arith.divf %31, %32 : vector<8x1xf32>
    %34 = vector.broadcast %26 : vector<8x1xf32> to vector<8x32xf32>
    %35 = arith.subf %20, %34 : vector<8x32xf32>
    %cst_11 = arith.constant 9.99999996E-13 : f32
    %36 = vector.broadcast %cst_11 : f32 to vector<8x1xf32>
    %37 = arith.addf %33, %36 : vector<8x1xf32>
    %38 = math.rsqrt %37 : vector<8x1xf32>
    %39 = vector.broadcast %38 : vector<8x1xf32> to vector<8x32xf32>
    %40 = arith.mulf %35, %39 : vector<8x32xf32>
    %41 = vector.broadcast %21 : vector<1x32xf32> to vector<8x32xf32>
    %42 = arith.mulf %40, %41 : vector<8x32xf32>
    %43 = vector.broadcast %22 : vector<1x32xf32> to vector<8x32xf32>
    %44 = arith.addf %42, %43 : vector<8x32xf32>
    %45 = arith.truncf %44 : vector<8x32xf32> to vector<8x32xbf16>
    %c0_12 = arith.constant 0 : index
    %c0_13 = arith.constant 0 : index
    %46 = vector.load %arg4[%c0_12, %c0_13] : memref<32x384xbf16, #tpu.memory_space<vmem>>, vector<32x384xbf16>
    %cst_14 = arith.constant dense<0.000000e+00> : vector<8x384xf32>
    %47 = tpu.matmul %45, %46, %cst_14 {dimension_numbers = #tpu.dot_dimension_numbers<[1], [0], [0], [1], [0, 0, 1, 1], [], []>} : vector<8x32xbf16>, vector<32x384xbf16>, vector<8x384xf32> -> vector<8x384xf32>
    %48 = vector.extract_strided_slice %47 {offsets = [0, 0], sizes = [8, 128], strides = [1, 1]} : vector<8x384xf32> to vector<8x128xf32>
    %c6 = arith.constant 6 : index
    %c0_15 = arith.constant 0 : index
    %49 = vector.load %arg3[%c6, %c0_15] : memref<26x128xf32, #tpu.memory_space<vmem>>, vector<1x128xf32>
    %50 = vector.broadcast %49 : vector<1x128xf32> to vector<8x128xf32>
    %51 = arith.addf %48, %50 : vector<8x128xf32>
    %52 = vector.extract_strided_slice %47 {offsets = [0, 128], sizes = [8, 128], strides = [1, 1]} : vector<8x384xf32> to vector<8x128xf32>
    %c7 = arith.constant 7 : index
    %c0_16 = arith.constant 0 : index
    %53 = vector.load %arg3[%c7, %c0_16] : memref<26x128xf32, #tpu.memory_space<vmem>>, vector<1x128xf32>
    %54 = vector.broadcast %53 : vector<1x128xf32> to vector<8x128xf32>
    %55 = arith.addf %52, %54 : vector<8x128xf32>
    %56 = vector.extract_strided_slice %47 {offsets = [0, 256], sizes = [8, 128], strides = [1, 1]} : vector<8x384xf32> to vector<8x128xf32>
    %c8 = arith.constant 8 : index
    %c0_17 = arith.constant 0 : index
    %57 = vector.load %arg3[%c8, %c0_17] : memref<26x128xf32, #tpu.memory_space<vmem>>, vector<1x128xf32>
    %58 = vector.broadcast %57 : vector<1x128xf32> to vector<8x128xf32>
    %59 = arith.addf %56, %58 : vector<8x128xf32>
    %60 = arith.truncf %55 : vector<8x128xf32> to vector<8x128xbf16>
    %61 = vector.broadcast %16 : vector<1x128xf32> to vector<8x128xf32>
    %62 = arith.mulf %51, %61 : vector<8x128xf32>
    %63 = arith.truncf %62 : vector<8x128xf32> to vector<8x128xbf16>
    %cst_18 = arith.constant dense<0.000000e+00> : vector<8x8xf32>
    %64 = tpu.matmul %63, %60, %cst_18 {dimension_numbers = #tpu.dot_dimension_numbers<[1], [1], [0], [0], [0, 0, 1, 0], [], []>} : vector<8x128xbf16>, vector<8x128xbf16>, vector<8x8xf32> -> vector<8x8xf32>
    %cst_19 = arith.constant dense<0xFF800000> : vector<8xf32>
    %65 = vector.multi_reduction <maximumf>, %64, %cst_19 [1] : vector<8x8xf32> to vector<8xf32>
    %66 = vector.shape_cast %65 : vector<8xf32> to vector<8x1xf32>
    %67 = vector.broadcast %66 : vector<8x1xf32> to vector<8x8xf32>
    %68 = arith.subf %64, %67 : vector<8x8xf32>
    %69 = math.exp %68 : vector<8x8xf32>
    %cst_20 = arith.constant dense<0.000000e+00> : vector<8xf32>
    %70 = vector.multi_reduction <add>, %69, %cst_20 [1] : vector<8x8xf32> to vector<8xf32>
    %71 = vector.shape_cast %70 : vector<8xf32> to vector<8x1xf32>
    %72 = tpu.reciprocal %71 {approx = true} : vector<8x1xf32> -> vector<8x1xf32>
    %73 = vector.broadcast %72 : vector<8x1xf32> to vector<8x8xf32>
    %74 = arith.mulf %69, %73 : vector<8x8xf32>
    %75 = vector.broadcast %7 : vector<1x128xf32> to vector<8x128xf32>
    %76 = arith.mulf %59, %75 : vector<8x128xf32>
    %77 = arith.truncf %76 : vector<8x128xf32> to vector<8x128xbf16>
    %78 = arith.truncf %74 : vector<8x8xf32> to vector<8x8xbf16>
    %cst_21 = arith.constant dense<0.000000e+00> : vector<8x128xf32>
    %79 = tpu.matmul %78, %77, %cst_21 {dimension_numbers = #tpu.dot_dimension_numbers<[1], [0], [0], [1], [0, 0, 1, 1], [], []>} : vector<8x8xbf16>, vector<8x128xbf16>, vector<8x128xf32> -> vector<8x128xf32>
    %80 = vector.broadcast %18 : vector<1x128xf32> to vector<8x128xf32>
    %81 = arith.mulf %51, %80 : vector<8x128xf32>
    %82 = arith.truncf %81 : vector<8x128xf32> to vector<8x128xbf16>
    %cst_22 = arith.constant dense<0.000000e+00> : vector<8x8xf32>
    %83 = tpu.matmul %82, %60, %cst_22 {dimension_numbers = #tpu.dot_dimension_numbers<[1], [1], [0], [0], [0, 0, 1, 0], [], []>} : vector<8x128xbf16>, vector<8x128xbf16>, vector<8x8xf32> -> vector<8x8xf32>
    %cst_23 = arith.constant dense<0xFF800000> : vector<8xf32>
    %84 = vector.multi_reduction <maximumf>, %83, %cst_23 [1] : vector<8x8xf32> to vector<8xf32>
    %85 = vector.shape_cast %84 : vector<8xf32> to vector<8x1xf32>
    %86 = vector.broadcast %85 : vector<8x1xf32> to vector<8x8xf32>
    %87 = arith.subf %83, %86 : vector<8x8xf32>
    %88 = math.exp %87 : vector<8x8xf32>
    %cst_24 = arith.constant dense<0.000000e+00> : vector<8xf32>
    %89 = vector.multi_reduction <add>, %88, %cst_24 [1] : vector<8x8xf32> to vector<8xf32>
    %90 = vector.shape_cast %89 : vector<8xf32> to vector<8x1xf32>
    %91 = tpu.reciprocal %90 {approx = true} : vector<8x1xf32> -> vector<8x1xf32>
    %92 = vector.broadcast %91 : vector<8x1xf32> to vector<8x8xf32>
    %93 = arith.mulf %88, %92 : vector<8x8xf32>
    %94 = vector.broadcast %14 : vector<1x128xf32> to vector<8x128xf32>
    %95 = arith.mulf %59, %94 : vector<8x128xf32>
    %96 = arith.truncf %95 : vector<8x128xf32> to vector<8x128xbf16>
    %97 = arith.truncf %93 : vector<8x8xf32> to vector<8x8xbf16>
    %cst_25 = arith.constant dense<0.000000e+00> : vector<8x128xf32>
    %98 = tpu.matmul %97, %96, %cst_25 {dimension_numbers = #tpu.dot_dimension_numbers<[1], [0], [0], [1], [0, 0, 1, 1], [], []>} : vector<8x8xbf16>, vector<8x128xbf16>, vector<8x128xf32> -> vector<8x128xf32>
    %99 = arith.addf %79, %98 : vector<8x128xf32>
    %100 = arith.truncf %99 : vector<8x128xf32> to vector<8x128xbf16>
    %c0_26 = arith.constant 0 : index
    %c0_27 = arith.constant 0 : index
    %101 = vector.load %arg5[%c0_26, %c0_27] : memref<128x32xbf16, #tpu.memory_space<vmem>>, vector<128x32xbf16>
    %cst_28 = arith.constant dense<0.000000e+00> : vector<8x32xf32>
    %102 = tpu.matmul %100, %101, %cst_28 {dimension_numbers = #tpu.dot_dimension_numbers<[1], [0], [0], [1], [0, 0, 1, 1], [], []>} : vector<8x128xbf16>, vector<128x32xbf16>, vector<8x32xf32> -> vector<8x32xf32>
    %c9 = arith.constant 9 : index
    %c0_29 = arith.constant 0 : index
    %103 = vector.load %arg3[%c9, %c0_29] : memref<26x128xf32, #tpu.memory_space<vmem>>, vector<1x32xf32>
    %104 = vector.broadcast %103 : vector<1x32xf32> to vector<8x32xf32>
    %105 = arith.addf %102, %104 : vector<8x32xf32>
    %106 = arith.addf %105, %44 : vector<8x32xf32>
    %c10 = arith.constant 10 : index
    %c0_30 = arith.constant 0 : index
    %107 = vector.load %arg3[%c10, %c0_30] : memref<26x128xf32, #tpu.memory_space<vmem>>, vector<1x32xf32>
    %c11 = arith.constant 11 : index
    %c0_31 = arith.constant 0 : index
    %108 = vector.load %arg3[%c11, %c0_31] : memref<26x128xf32, #tpu.memory_space<vmem>>, vector<1x32xf32>
    %cst_32 = arith.constant dense<0.000000e+00> : vector<8xf32>
    %109 = vector.multi_reduction <add>, %106, %cst_32 [1] : vector<8x32xf32> to vector<8xf32>
    %110 = vector.shape_cast %109 : vector<8xf32> to vector<8x1xf32>
    %cst_33 = arith.constant 3.200000e+01 : f32
    %111 = vector.broadcast %cst_33 : f32 to vector<8x1xf32>
    %112 = arith.divf %110, %111 : vector<8x1xf32>
    %113 = vector.broadcast %112 : vector<8x1xf32> to vector<8x32xf32>
    %114 = arith.subf %106, %113 : vector<8x32xf32>
    %115 = arith.mulf %114, %114 : vector<8x32xf32>
    %cst_34 = arith.constant dense<0.000000e+00> : vector<8xf32>
    %116 = vector.multi_reduction <add>, %115, %cst_34 [1] : vector<8x32xf32> to vector<8xf32>
    %117 = vector.shape_cast %116 : vector<8xf32> to vector<8x1xf32>
    %cst_35 = arith.constant 3.200000e+01 : f32
    %118 = vector.broadcast %cst_35 : f32 to vector<8x1xf32>
    %119 = arith.divf %117, %118 : vector<8x1xf32>
    %120 = vector.broadcast %112 : vector<8x1xf32> to vector<8x32xf32>
    %121 = arith.subf %106, %120 : vector<8x32xf32>
    %cst_36 = arith.constant 9.99999996E-13 : f32
    %122 = vector.broadcast %cst_36 : f32 to vector<8x1xf32>
    %123 = arith.addf %119, %122 : vector<8x1xf32>
    %124 = math.rsqrt %123 : vector<8x1xf32>
    %125 = vector.broadcast %124 : vector<8x1xf32> to vector<8x32xf32>
    %126 = arith.mulf %121, %125 : vector<8x32xf32>
    %127 = vector.broadcast %107 : vector<1x32xf32> to vector<8x32xf32>
    %128 = arith.mulf %126, %127 : vector<8x32xf32>
    %129 = vector.broadcast %108 : vector<1x32xf32> to vector<8x32xf32>
    %130 = arith.addf %128, %129 : vector<8x32xf32>
    %131 = arith.truncf %130 : vector<8x32xf32> to vector<8x32xbf16>
    %c0_37 = arith.constant 0 : index
    %c0_38 = arith.constant 0 : index
    %132 = vector.load %arg6[%c0_37, %c0_38] : memref<32x64xbf16, #tpu.memory_space<vmem>>, vector<32x64xbf16>
    %cst_39 = arith.constant dense<0.000000e+00> : vector<8x64xf32>
    %133 = tpu.matmul %131, %132, %cst_39 {dimension_numbers = #tpu.dot_dimension_numbers<[1], [0], [0], [1], [0, 0, 1, 1], [], []>} : vector<8x32xbf16>, vector<32x64xbf16>, vector<8x64xf32> -> vector<8x64xf32>
    %c12 = arith.constant 12 : index
    %c0_40 = arith.constant 0 : index
    %134 = vector.load %arg3[%c12, %c0_40] : memref<26x128xf32, #tpu.memory_space<vmem>>, vector<1x64xf32>
    %135 = vector.broadcast %134 : vector<1x64xf32> to vector<8x64xf32>
    %136 = arith.addf %133, %135 : vector<8x64xf32>
    %137 = arith.mulf %136, %136 : vector<8x64xf32>
    %138 = arith.mulf %136, %137 : vector<8x64xf32>
    %cst_41 = arith.constant 4.471500e-02 : f32
    %139 = vector.broadcast %cst_41 : f32 to vector<8x64xf32>
    %140 = arith.mulf %139, %138 : vector<8x64xf32>
    %141 = arith.addf %136, %140 : vector<8x64xf32>
    %cst_42 = arith.constant 0.797884583 : f32
    %142 = vector.broadcast %cst_42 : f32 to vector<8x64xf32>
    %143 = arith.mulf %142, %141 : vector<8x64xf32>
    %144 = math.tanh %143 : vector<8x64xf32>
    %cst_43 = arith.constant 1.000000e+00 : f32
    %145 = vector.broadcast %cst_43 : f32 to vector<8x64xf32>
    %146 = arith.addf %145, %144 : vector<8x64xf32>
    %cst_44 = arith.constant 5.000000e-01 : f32
    %147 = vector.broadcast %cst_44 : f32 to vector<8x64xf32>
    %148 = arith.mulf %147, %146 : vector<8x64xf32>
    %149 = arith.mulf %136, %148 : vector<8x64xf32>
    %150 = arith.truncf %149 : vector<8x64xf32> to vector<8x64xbf16>
    %c0_45 = arith.constant 0 : index
    %c0_46 = arith.constant 0 : index
    %151 = vector.load %arg7[%c0_45, %c0_46] : memref<64x32xbf16, #tpu.memory_space<vmem>>, vector<64x32xbf16>
    %cst_47 = arith.constant dense<0.000000e+00> : vector<8x32xf32>
    %152 = tpu.matmul %150, %151, %cst_47 {dimension_numbers = #tpu.dot_dimension_numbers<[1], [0], [0], [1], [0, 0, 1, 1], [], []>} : vector<8x64xbf16>, vector<64x32xbf16>, vector<8x32xf32> -> vector<8x32xf32>
    %c13 = arith.constant 13 : index
    %c0_48 = arith.constant 0 : index
    %153 = vector.load %arg3[%c13, %c0_48] : memref<26x128xf32, #tpu.memory_space<vmem>>, vector<1x32xf32>
    %154 = vector.broadcast %153 : vector<1x32xf32> to vector<8x32xf32>
    %155 = arith.addf %152, %154 : vector<8x32xf32>
    %156 = arith.addf %155, %130 : vector<8x32xf32>
    %c14 = arith.constant 14 : index
    %c0_49 = arith.constant 0 : index
    %157 = vector.load %arg3[%c14, %c0_49] : memref<26x128xf32, #tpu.memory_space<vmem>>, vector<1x32xf32>
    %c15 = arith.constant 15 : index
    %c0_50 = arith.constant 0 : index
    %158 = vector.load %arg3[%c15, %c0_50] : memref<26x128xf32, #tpu.memory_space<vmem>>, vector<1x32xf32>
    %cst_51 = arith.constant dense<0.000000e+00> : vector<8xf32>
    %159 = vector.multi_reduction <add>, %156, %cst_51 [1] : vector<8x32xf32> to vector<8xf32>
    %160 = vector.shape_cast %159 : vector<8xf32> to vector<8x1xf32>
    %cst_52 = arith.constant 3.200000e+01 : f32
    %161 = vector.broadcast %cst_52 : f32 to vector<8x1xf32>
    %162 = arith.divf %160, %161 : vector<8x1xf32>
    %163 = vector.broadcast %162 : vector<8x1xf32> to vector<8x32xf32>
    %164 = arith.subf %156, %163 : vector<8x32xf32>
    %165 = arith.mulf %164, %164 : vector<8x32xf32>
    %cst_53 = arith.constant dense<0.000000e+00> : vector<8xf32>
    %166 = vector.multi_reduction <add>, %165, %cst_53 [1] : vector<8x32xf32> to vector<8xf32>
    %167 = vector.shape_cast %166 : vector<8xf32> to vector<8x1xf32>
    %cst_54 = arith.constant 3.200000e+01 : f32
    %168 = vector.broadcast %cst_54 : f32 to vector<8x1xf32>
    %169 = arith.divf %167, %168 : vector<8x1xf32>
    %170 = vector.broadcast %162 : vector<8x1xf32> to vector<8x32xf32>
    %171 = arith.subf %156, %170 : vector<8x32xf32>
    %cst_55 = arith.constant 9.99999996E-13 : f32
    %172 = vector.broadcast %cst_55 : f32 to vector<8x1xf32>
    %173 = arith.addf %169, %172 : vector<8x1xf32>
    %174 = math.rsqrt %173 : vector<8x1xf32>
    %175 = vector.broadcast %174 : vector<8x1xf32> to vector<8x32xf32>
    %176 = arith.mulf %171, %175 : vector<8x32xf32>
    %177 = vector.broadcast %157 : vector<1x32xf32> to vector<8x32xf32>
    %178 = arith.mulf %176, %177 : vector<8x32xf32>
    %179 = vector.broadcast %158 : vector<1x32xf32> to vector<8x32xf32>
    %180 = arith.addf %178, %179 : vector<8x32xf32>
    %181 = arith.truncf %180 : vector<8x32xf32> to vector<8x32xbf16>
    %c0_56 = arith.constant 0 : index
    %c0_57 = arith.constant 0 : index
    %182 = vector.load %arg8[%c0_56, %c0_57] : memref<32x384xbf16, #tpu.memory_space<vmem>>, vector<32x384xbf16>
    %cst_58 = arith.constant dense<0.000000e+00> : vector<8x384xf32>
    %183 = tpu.matmul %181, %182, %cst_58 {dimension_numbers = #tpu.dot_dimension_numbers<[1], [0], [0], [1], [0, 0, 1, 1], [], []>} : vector<8x32xbf16>, vector<32x384xbf16>, vector<8x384xf32> -> vector<8x384xf32>
    %184 = vector.extract_strided_slice %183 {offsets = [0, 0], sizes = [8, 128], strides = [1, 1]} : vector<8x384xf32> to vector<8x128xf32>
    %c16 = arith.constant 16 : index
    %c0_59 = arith.constant 0 : index
    %185 = vector.load %arg3[%c16, %c0_59] : memref<26x128xf32, #tpu.memory_space<vmem>>, vector<1x128xf32>
    %186 = vector.broadcast %185 : vector<1x128xf32> to vector<8x128xf32>
    %187 = arith.addf %184, %186 : vector<8x128xf32>
    %188 = vector.extract_strided_slice %183 {offsets = [0, 128], sizes = [8, 128], strides = [1, 1]} : vector<8x384xf32> to vector<8x128xf32>
    %c17 = arith.constant 17 : index
    %c0_60 = arith.constant 0 : index
    %189 = vector.load %arg3[%c17, %c0_60] : memref<26x128xf32, #tpu.memory_space<vmem>>, vector<1x128xf32>
    %190 = vector.broadcast %189 : vector<1x128xf32> to vector<8x128xf32>
    %191 = arith.addf %188, %190 : vector<8x128xf32>
    %192 = vector.extract_strided_slice %183 {offsets = [0, 256], sizes = [8, 128], strides = [1, 1]} : vector<8x384xf32> to vector<8x128xf32>
    %c18 = arith.constant 18 : index
    %c0_61 = arith.constant 0 : index
    %193 = vector.load %arg3[%c18, %c0_61] : memref<26x128xf32, #tpu.memory_space<vmem>>, vector<1x128xf32>
    %194 = vector.broadcast %193 : vector<1x128xf32> to vector<8x128xf32>
    %195 = arith.addf %192, %194 : vector<8x128xf32>
    %196 = arith.truncf %191 : vector<8x128xf32> to vector<8x128xbf16>
    %197 = vector.broadcast %16 : vector<1x128xf32> to vector<8x128xf32>
    %198 = arith.mulf %187, %197 : vector<8x128xf32>
    %199 = arith.truncf %198 : vector<8x128xf32> to vector<8x128xbf16>
    %cst_62 = arith.constant dense<0.000000e+00> : vector<8x8xf32>
    %200 = tpu.matmul %199, %196, %cst_62 {dimension_numbers = #tpu.dot_dimension_numbers<[1], [1], [0], [0], [0, 0, 1, 0], [], []>} : vector<8x128xbf16>, vector<8x128xbf16>, vector<8x8xf32> -> vector<8x8xf32>
    %cst_63 = arith.constant dense<0xFF800000> : vector<8xf32>
    %201 = vector.multi_reduction <maximumf>, %200, %cst_63 [1] : vector<8x8xf32> to vector<8xf32>
    %202 = vector.shape_cast %201 : vector<8xf32> to vector<8x1xf32>
    %203 = vector.broadcast %202 : vector<8x1xf32> to vector<8x8xf32>
    %204 = arith.subf %200, %203 : vector<8x8xf32>
    %205 = math.exp %204 : vector<8x8xf32>
    %cst_64 = arith.constant dense<0.000000e+00> : vector<8xf32>
    %206 = vector.multi_reduction <add>, %205, %cst_64 [1] : vector<8x8xf32> to vector<8xf32>
    %207 = vector.shape_cast %206 : vector<8xf32> to vector<8x1xf32>
    %208 = tpu.reciprocal %207 {approx = true} : vector<8x1xf32> -> vector<8x1xf32>
    %209 = vector.broadcast %208 : vector<8x1xf32> to vector<8x8xf32>
    %210 = arith.mulf %205, %209 : vector<8x8xf32>
    %211 = vector.broadcast %7 : vector<1x128xf32> to vector<8x128xf32>
    %212 = arith.mulf %195, %211 : vector<8x128xf32>
    %213 = arith.truncf %212 : vector<8x128xf32> to vector<8x128xbf16>
    %214 = arith.truncf %210 : vector<8x8xf32> to vector<8x8xbf16>
    %cst_65 = arith.constant dense<0.000000e+00> : vector<8x128xf32>
    %215 = tpu.matmul %214, %213, %cst_65 {dimension_numbers = #tpu.dot_dimension_numbers<[1], [0], [0], [1], [0, 0, 1, 1], [], []>} : vector<8x8xbf16>, vector<8x128xbf16>, vector<8x128xf32> -> vector<8x128xf32>
    %216 = vector.broadcast %18 : vector<1x128xf32> to vector<8x128xf32>
    %217 = arith.mulf %187, %216 : vector<8x128xf32>
    %218 = arith.truncf %217 : vector<8x128xf32> to vector<8x128xbf16>
    %cst_66 = arith.constant dense<0.000000e+00> : vector<8x8xf32>
    %219 = tpu.matmul %218, %196, %cst_66 {dimension_numbers = #tpu.dot_dimension_numbers<[1], [1], [0], [0], [0, 0, 1, 0], [], []>} : vector<8x128xbf16>, vector<8x128xbf16>, vector<8x8xf32> -> vector<8x8xf32>
    %cst_67 = arith.constant dense<0xFF800000> : vector<8xf32>
    %220 = vector.multi_reduction <maximumf>, %219, %cst_67 [1] : vector<8x8xf32> to vector<8xf32>
    %221 = vector.shape_cast %220 : vector<8xf32> to vector<8x1xf32>
    %222 = vector.broadcast %221 : vector<8x1xf32> to vector<8x8xf32>
    %223 = arith.subf %219, %222 : vector<8x8xf32>
    %224 = math.exp %223 : vector<8x8xf32>
    %cst_68 = arith.constant dense<0.000000e+00> : vector<8xf32>
    %225 = vector.multi_reduction <add>, %224, %cst_68 [1] : vector<8x8xf32> to vector<8xf32>
    %226 = vector.shape_cast %225 : vector<8xf32> to vector<8x1xf32>
    %227 = tpu.reciprocal %226 {approx = true} : vector<8x1xf32> -> vector<8x1xf32>
    %228 = vector.broadcast %227 : vector<8x1xf32> to vector<8x8xf32>
    %229 = arith.mulf %224, %228 : vector<8x8xf32>
    %230 = vector.broadcast %14 : vector<1x128xf32> to vector<8x128xf32>
    %231 = arith.mulf %195, %230 : vector<8x128xf32>
    %232 = arith.truncf %231 : vector<8x128xf32> to vector<8x128xbf16>
    %233 = arith.truncf %229 : vector<8x8xf32> to vector<8x8xbf16>
    %cst_69 = arith.constant dense<0.000000e+00> : vector<8x128xf32>
    %234 = tpu.matmul %233, %232, %cst_69 {dimension_numbers = #tpu.dot_dimension_numbers<[1], [0], [0], [1], [0, 0, 1, 1], [], []>} : vector<8x8xbf16>, vector<8x128xbf16>, vector<8x128xf32> -> vector<8x128xf32>
    %235 = arith.addf %215, %234 : vector<8x128xf32>
    %236 = arith.truncf %235 : vector<8x128xf32> to vector<8x128xbf16>
    %c0_70 = arith.constant 0 : index
    %c0_71 = arith.constant 0 : index
    %237 = vector.load %arg9[%c0_70, %c0_71] : memref<128x32xbf16, #tpu.memory_space<vmem>>, vector<128x32xbf16>
    %cst_72 = arith.constant dense<0.000000e+00> : vector<8x32xf32>
    %238 = tpu.matmul %236, %237, %cst_72 {dimension_numbers = #tpu.dot_dimension_numbers<[1], [0], [0], [1], [0, 0, 1, 1], [], []>} : vector<8x128xbf16>, vector<128x32xbf16>, vector<8x32xf32> -> vector<8x32xf32>
    %c19 = arith.constant 19 : index
    %c0_73 = arith.constant 0 : index
    %239 = vector.load %arg3[%c19, %c0_73] : memref<26x128xf32, #tpu.memory_space<vmem>>, vector<1x32xf32>
    %240 = vector.broadcast %239 : vector<1x32xf32> to vector<8x32xf32>
    %241 = arith.addf %238, %240 : vector<8x32xf32>
    %242 = arith.addf %241, %180 : vector<8x32xf32>
    %c20 = arith.constant 20 : index
    %c0_74 = arith.constant 0 : index
    %243 = vector.load %arg3[%c20, %c0_74] : memref<26x128xf32, #tpu.memory_space<vmem>>, vector<1x32xf32>
    %c21 = arith.constant 21 : index
    %c0_75 = arith.constant 0 : index
    %244 = vector.load %arg3[%c21, %c0_75] : memref<26x128xf32, #tpu.memory_space<vmem>>, vector<1x32xf32>
    %cst_76 = arith.constant dense<0.000000e+00> : vector<8xf32>
    %245 = vector.multi_reduction <add>, %242, %cst_76 [1] : vector<8x32xf32> to vector<8xf32>
    %246 = vector.shape_cast %245 : vector<8xf32> to vector<8x1xf32>
    %cst_77 = arith.constant 3.200000e+01 : f32
    %247 = vector.broadcast %cst_77 : f32 to vector<8x1xf32>
    %248 = arith.divf %246, %247 : vector<8x1xf32>
    %249 = vector.broadcast %248 : vector<8x1xf32> to vector<8x32xf32>
    %250 = arith.subf %242, %249 : vector<8x32xf32>
    %251 = arith.mulf %250, %250 : vector<8x32xf32>
    %cst_78 = arith.constant dense<0.000000e+00> : vector<8xf32>
    %252 = vector.multi_reduction <add>, %251, %cst_78 [1] : vector<8x32xf32> to vector<8xf32>
    %253 = vector.shape_cast %252 : vector<8xf32> to vector<8x1xf32>
    %cst_79 = arith.constant 3.200000e+01 : f32
    %254 = vector.broadcast %cst_79 : f32 to vector<8x1xf32>
    %255 = arith.divf %253, %254 : vector<8x1xf32>
    %256 = vector.broadcast %248 : vector<8x1xf32> to vector<8x32xf32>
    %257 = arith.subf %242, %256 : vector<8x32xf32>
    %cst_80 = arith.constant 9.99999996E-13 : f32
    %258 = vector.broadcast %cst_80 : f32 to vector<8x1xf32>
    %259 = arith.addf %255, %258 : vector<8x1xf32>
    %260 = math.rsqrt %259 : vector<8x1xf32>
    %261 = vector.broadcast %260 : vector<8x1xf32> to vector<8x32xf32>
    %262 = arith.mulf %257, %261 : vector<8x32xf32>
    %263 = vector.broadcast %243 : vector<1x32xf32> to vector<8x32xf32>
    %264 = arith.mulf %262, %263 : vector<8x32xf32>
    %265 = vector.broadcast %244 : vector<1x32xf32> to vector<8x32xf32>
    %266 = arith.addf %264, %265 : vector<8x32xf32>
    %267 = arith.truncf %266 : vector<8x32xf32> to vector<8x32xbf16>
    %c0_81 = arith.constant 0 : index
    %c0_82 = arith.constant 0 : index
    %268 = vector.load %arg10[%c0_81, %c0_82] : memref<32x64xbf16, #tpu.memory_space<vmem>>, vector<32x64xbf16>
    %cst_83 = arith.constant dense<0.000000e+00> : vector<8x64xf32>
    %269 = tpu.matmul %267, %268, %cst_83 {dimension_numbers = #tpu.dot_dimension_numbers<[1], [0], [0], [1], [0, 0, 1, 1], [], []>} : vector<8x32xbf16>, vector<32x64xbf16>, vector<8x64xf32> -> vector<8x64xf32>
    %c22 = arith.constant 22 : index
    %c0_84 = arith.constant 0 : index
    %270 = vector.load %arg3[%c22, %c0_84] : memref<26x128xf32, #tpu.memory_space<vmem>>, vector<1x64xf32>
    %271 = vector.broadcast %270 : vector<1x64xf32> to vector<8x64xf32>
    %272 = arith.addf %269, %271 : vector<8x64xf32>
    %273 = arith.mulf %272, %272 : vector<8x64xf32>
    %274 = arith.mulf %272, %273 : vector<8x64xf32>
    %cst_85 = arith.constant 4.471500e-02 : f32
    %275 = vector.broadcast %cst_85 : f32 to vector<8x64xf32>
    %276 = arith.mulf %275, %274 : vector<8x64xf32>
    %277 = arith.addf %272, %276 : vector<8x64xf32>
    %cst_86 = arith.constant 0.797884583 : f32
    %278 = vector.broadcast %cst_86 : f32 to vector<8x64xf32>
    %279 = arith.mulf %278, %277 : vector<8x64xf32>
    %280 = math.tanh %279 : vector<8x64xf32>
    %cst_87 = arith.constant 1.000000e+00 : f32
    %281 = vector.broadcast %cst_87 : f32 to vector<8x64xf32>
    %282 = arith.addf %281, %280 : vector<8x64xf32>
    %cst_88 = arith.constant 5.000000e-01 : f32
    %283 = vector.broadcast %cst_88 : f32 to vector<8x64xf32>
    %284 = arith.mulf %283, %282 : vector<8x64xf32>
    %285 = arith.mulf %272, %284 : vector<8x64xf32>
    %286 = arith.truncf %285 : vector<8x64xf32> to vector<8x64xbf16>
    %c0_89 = arith.constant 0 : index
    %c0_90 = arith.constant 0 : index
    %287 = vector.load %arg11[%c0_89, %c0_90] : memref<64x32xbf16, #tpu.memory_space<vmem>>, vector<64x32xbf16>
    %cst_91 = arith.constant dense<0.000000e+00> : vector<8x32xf32>
    %288 = tpu.matmul %286, %287, %cst_91 {dimension_numbers = #tpu.dot_dimension_numbers<[1], [0], [0], [1], [0, 0, 1, 1], [], []>} : vector<8x64xbf16>, vector<64x32xbf16>, vector<8x32xf32> -> vector<8x32xf32>
    %c23 = arith.constant 23 : index
    %c0_92 = arith.constant 0 : index
    %289 = vector.load %arg3[%c23, %c0_92] : memref<26x128xf32, #tpu.memory_space<vmem>>, vector<1x32xf32>
    %290 = vector.broadcast %289 : vector<1x32xf32> to vector<8x32xf32>
    %291 = arith.addf %288, %290 : vector<8x32xf32>
    %292 = arith.addf %291, %266 : vector<8x32xf32>
    %c24 = arith.constant 24 : index
    %c0_93 = arith.constant 0 : index
    %293 = vector.load %arg3[%c24, %c0_93] : memref<26x128xf32, #tpu.memory_space<vmem>>, vector<1x32xf32>
    %c25 = arith.constant 25 : index
    %c0_94 = arith.constant 0 : index
    %294 = vector.load %arg3[%c25, %c0_94] : memref<26x128xf32, #tpu.memory_space<vmem>>, vector<1x32xf32>
    %cst_95 = arith.constant dense<0.000000e+00> : vector<8xf32>
    %295 = vector.multi_reduction <add>, %292, %cst_95 [1] : vector<8x32xf32> to vector<8xf32>
    %296 = vector.shape_cast %295 : vector<8xf32> to vector<8x1xf32>
    %cst_96 = arith.constant 3.200000e+01 : f32
    %297 = vector.broadcast %cst_96 : f32 to vector<8x1xf32>
    %298 = arith.divf %296, %297 : vector<8x1xf32>
    %299 = vector.broadcast %298 : vector<8x1xf32> to vector<8x32xf32>
    %300 = arith.subf %292, %299 : vector<8x32xf32>
    %301 = arith.mulf %300, %300 : vector<8x32xf32>
    %cst_97 = arith.constant dense<0.000000e+00> : vector<8xf32>
    %302 = vector.multi_reduction <add>, %301, %cst_97 [1] : vector<8x32xf32> to vector<8xf32>
    %303 = vector.shape_cast %302 : vector<8xf32> to vector<8x1xf32>
    %cst_98 = arith.constant 3.200000e+01 : f32
    %304 = vector.broadcast %cst_98 : f32 to vector<8x1xf32>
    %305 = arith.divf %303, %304 : vector<8x1xf32>
    %306 = vector.broadcast %298 : vector<8x1xf32> to vector<8x32xf32>
    %307 = arith.subf %292, %306 : vector<8x32xf32>
    %cst_99 = arith.constant 9.99999996E-13 : f32
    %308 = vector.broadcast %cst_99 : f32 to vector<8x1xf32>
    %309 = arith.addf %305, %308 : vector<8x1xf32>
    %310 = math.rsqrt %309 : vector<8x1xf32>
    %311 = vector.broadcast %310 : vector<8x1xf32> to vector<8x32xf32>
    %312 = arith.mulf %307, %311 : vector<8x32xf32>
    %313 = vector.broadcast %293 : vector<1x32xf32> to vector<8x32xf32>
    %314 = arith.mulf %312, %313 : vector<8x32xf32>
    %315 = vector.broadcast %294 : vector<1x32xf32> to vector<8x32xf32>
    %316 = arith.addf %314, %315 : vector<8x32xf32>
    %317 = arith.truncf %316 : vector<8x32xf32> to vector<8x32xbf16>
    %c0_100 = arith.constant 0 : index
    %c0_101 = arith.constant 0 : index
    %318 = vector.load %arg12[%c0_100, %c0_101] : memref<32x32xbf16, #tpu.memory_space<vmem>>, vector<32x32xbf16>
    %cst_102 = arith.constant dense<0.000000e+00> : vector<8x32xf32>
    %319 = tpu.matmul %317, %318, %cst_102 {dimension_numbers = #tpu.dot_dimension_numbers<[1], [0], [0], [1], [0, 0, 1, 1], [], []>} : vector<8x32xbf16>, vector<32x32xbf16>, vector<8x32xf32> -> vector<8x32xf32>
    %c2 = arith.constant 2 : index
    %c0_103 = arith.constant 0 : index
    %320 = vector.load %arg3[%c2, %c0_103] : memref<26x128xf32, #tpu.memory_space<vmem>>, vector<1x32xf32>
    %321 = vector.broadcast %320 : vector<1x32xf32> to vector<8x32xf32>
    %322 = arith.addf %319, %321 : vector<8x32xf32>
    %323 = arith.mulf %322, %322 : vector<8x32xf32>
    %324 = arith.mulf %322, %323 : vector<8x32xf32>
    %cst_104 = arith.constant 4.471500e-02 : f32
    %325 = vector.broadcast %cst_104 : f32 to vector<8x32xf32>
    %326 = arith.mulf %325, %324 : vector<8x32xf32>
    %327 = arith.addf %322, %326 : vector<8x32xf32>
    %cst_105 = arith.constant 0.797884583 : f32
    %328 = vector.broadcast %cst_105 : f32 to vector<8x32xf32>
    %329 = arith.mulf %328, %327 : vector<8x32xf32>
    %330 = math.tanh %329 : vector<8x32xf32>
    %cst_106 = arith.constant 1.000000e+00 : f32
    %331 = vector.broadcast %cst_106 : f32 to vector<8x32xf32>
    %332 = arith.addf %331, %330 : vector<8x32xf32>
    %cst_107 = arith.constant 5.000000e-01 : f32
    %333 = vector.broadcast %cst_107 : f32 to vector<8x32xf32>
    %334 = arith.mulf %333, %332 : vector<8x32xf32>
    %335 = arith.mulf %322, %334 : vector<8x32xf32>
    %c3 = arith.constant 3 : index
    %c0_108 = arith.constant 0 : index
    %336 = vector.load %arg3[%c3, %c0_108] : memref<26x128xf32, #tpu.memory_space<vmem>>, vector<1x32xf32>
    %c4 = arith.constant 4 : index
    %c0_109 = arith.constant 0 : index
    %337 = vector.load %arg3[%c4, %c0_109] : memref<26x128xf32, #tpu.memory_space<vmem>>, vector<1x32xf32>
    %cst_110 = arith.constant dense<0.000000e+00> : vector<8xf32>
    %338 = vector.multi_reduction <add>, %335, %cst_110 [1] : vector<8x32xf32> to vector<8xf32>
    %339 = vector.shape_cast %338 : vector<8xf32> to vector<8x1xf32>
    %cst_111 = arith.constant 3.200000e+01 : f32
    %340 = vector.broadcast %cst_111 : f32 to vector<8x1xf32>
    %341 = arith.divf %339, %340 : vector<8x1xf32>
    %342 = vector.broadcast %341 : vector<8x1xf32> to vector<8x32xf32>
    %343 = arith.subf %335, %342 : vector<8x32xf32>
    %344 = arith.mulf %343, %343 : vector<8x32xf32>
    %cst_112 = arith.constant dense<0.000000e+00> : vector<8xf32>
    %345 = vector.multi_reduction <add>, %344, %cst_112 [1] : vector<8x32xf32> to vector<8xf32>
    %346 = vector.shape_cast %345 : vector<8xf32> to vector<8x1xf32>
    %cst_113 = arith.constant 3.200000e+01 : f32
    %347 = vector.broadcast %cst_113 : f32 to vector<8x1xf32>
    %348 = arith.divf %346, %347 : vector<8x1xf32>
    %349 = vector.broadcast %341 : vector<8x1xf32> to vector<8x32xf32>
    %350 = arith.subf %335, %349 : vector<8x32xf32>
    %cst_114 = arith.constant 9.99999996E-13 : f32
    %351 = vector.broadcast %cst_114 : f32 to vector<8x1xf32>
    %352 = arith.addf %348, %351 : vector<8x1xf32>
    %353 = math.rsqrt %352 : vector<8x1xf32>
    %354 = vector.broadcast %353 : vector<8x1xf32> to vector<8x32xf32>
    %355 = arith.mulf %350, %354 : vector<8x32xf32>
    %356 = vector.broadcast %336 : vector<1x32xf32> to vector<8x32xf32>
    %357 = arith.mulf %355, %356 : vector<8x32xf32>
    %358 = vector.broadcast %337 : vector<1x32xf32> to vector<8x32xf32>
    %359 = arith.addf %357, %358 : vector<8x32xf32>
    %360 = arith.truncf %359 : vector<8x32xf32> to vector<8x32xbf16>
    %c0_115 = arith.constant 0 : index
    %c0_116 = arith.constant 0 : index
    %361 = vector.load %arg13[%c0_115, %c0_116] : memref<32x128xbf16, #tpu.memory_space<vmem>>, vector<32x128xbf16>
    %cst_117 = arith.constant dense<0.000000e+00> : vector<8x128xf32>
    %362 = tpu.matmul %360, %361, %cst_117 {dimension_numbers = #tpu.dot_dimension_numbers<[1], [0], [0], [1], [0, 0, 1, 1], [], []>} : vector<8x32xbf16>, vector<32x128xbf16>, vector<8x128xf32> -> vector<8x128xf32>
    %c5 = arith.constant 5 : index
    %c0_118 = arith.constant 0 : index
    %363 = vector.load %arg3[%c5, %c0_118] : memref<26x128xf32, #tpu.memory_space<vmem>>, vector<1x128xf32>
    %364 = vector.broadcast %363 : vector<1x128xf32> to vector<8x128xf32>
    %365 = arith.addf %362, %364 : vector<8x128xf32>
    %c0_119 = arith.constant 0 : index
    %c0_120 = arith.constant 0 : index
    %c0_121 = arith.constant 0 : index
    %366 = vector.load %arg14[%c0_119, %c0_120, %c0_121] : memref<1x8x128xf32, #tpu.memory_space<vmem>>, vector<1x8x128xf32>
    %367 = vector.shape_cast %366 : vector<1x8x128xf32> to vector<8x128xf32>
    %368 = vector.shape_cast %365 : vector<8x128xf32> to vector<1x8x128xf32>
    tpu.vector_store %arg14[%c0_119, %c0_120, %c0_121], %368 {strides = array<i32>} : memref<1x8x128xf32, #tpu.memory_space<vmem>>, vector<1x8x128xf32>,
    %c0_122 = arith.constant 0 : index
    %c0_123 = arith.constant 0 : index
    %c0_124 = arith.constant 0 : index
    %369 = vector.load %arg2[%c0_122, %c0_123, %c0_124] : memref<1x8x1xi32, #tpu.memory_space<vmem>>, vector<1x8x1xi32>
    %370 = vector.shape_cast %369 : vector<1x8x1xi32> to vector<8x1xi32>
    %cst_125 = arith.constant dense<0xFF800000> : vector<8xf32>
    %371 = vector.multi_reduction <maximumf>, %365, %cst_125 [1] : vector<8x128xf32> to vector<8xf32>
    %372 = vector.shape_cast %371 : vector<8xf32> to vector<8x1xf32>
    %373 = vector.broadcast %372 : vector<8x1xf32> to vector<8x128xf32>
    %374 = arith.subf %365, %373 : vector<8x128xf32>
    %375 = math.exp %374 : vector<8x128xf32>
    %cst_126 = arith.constant dense<0.000000e+00> : vector<8xf32>
    %376 = vector.multi_reduction <add>, %375, %cst_126 [1] : vector<8x128xf32> to vector<8xf32>
    %377 = vector.shape_cast %376 : vector<8xf32> to vector<8x1xf32>
    %378 = math.log %377 : vector<8x1xf32>
    %379 = arith.addf %378, %372 : vector<8x1xf32>
    %380 = tpu.iota {dimensions = array<i32: 1>} : vector<8x128xi32>
    %381 = vector.broadcast %370 : vector<8x1xi32> to vector<8x128xi32>
    %382 = arith.cmpi eq, %380, %381 : vector<8x128xi32>
    %cst_127 = arith.constant 0.000000e+00 : f32
    %383 = vector.broadcast %cst_127 : f32 to vector<8x128xf32>
    %384 = arith.select %382, %365, %383 : vector<8x128xi1>, vector<8x128xf32>
    %cst_128 = arith.constant dense<0.000000e+00> : vector<8xf32>
    %385 = vector.multi_reduction <add>, %384, %cst_128 [1] : vector<8x128xf32> to vector<8xf32>
    %386 = vector.shape_cast %385 : vector<8xf32> to vector<8x1xf32>
    %c-100_i32 = arith.constant -100 : i32
    %387 = vector.broadcast %c-100_i32 : i32 to vector<8x1xi32>
    %388 = arith.cmpi ne, %370, %387 : vector<8x1xi32>
    %389 = arith.extui %388 : vector<8x1xi1> to vector<8x1xi32>
    %390 = arith.sitofp %389 : vector<8x1xi32> to vector<8x1xf32>
    %391 = arith.subf %379, %386 : vector<8x1xf32>
    %392 = arith.mulf %391, %390 : vector<8x1xf32>
    %393 = vector.shape_cast %392 : vector<8x1xf32> to vector<1x8x1xf32>
    %cst_129 = arith.constant dense<0.000000e+00> : vector<1xf32>
    %394 = vector.multi_reduction <add>, %393, %cst_129 [1, 2] : vector<1x8x1xf32> to vector<1xf32>
    %395 = vector.shape_cast %394 : vector<1xf32> to vector<1x1x1xf32>
    %396 = vector.extract %395[0, 0, 0] : f32 from vector<1x1x1xf32>
    %397 = vector.shape_cast %390 : vector<8x1xf32> to vector<1x8x1xf32>
    %cst_130 = arith.constant dense<0.000000e+00> : vector<1xf32>
    %398 = vector.multi_reduction <add>, %397, %cst_130 [1, 2] : vector<1x8x1xf32> to vector<1xf32>
    %399 = vector.shape_cast %398 : vector<1xf32> to vector<1x1x1xf32>
    %400 = vector.extract %399[0, 0, 0] : f32 from vector<1x1x1xf32>
    %401 = tpu.iota {dimensions = array<i32: 1>} : vector<8x128xi32>
    %c0_i32_131 = arith.constant 0 : i32
    %402 = vector.broadcast %c0_i32_131 : i32 to vector<8x128xi32>
    %403 = arith.cmpi eq, %401, %402 : vector<8x128xi32>
    %c1_i32 = arith.constant 1 : i32
    %404 = vector.broadcast %c1_i32 : i32 to vector<8x128xi32>
    %405 = arith.cmpi eq, %401, %404 : vector<8x128xi32>
    %cst_132 = arith.constant 0.000000e+00 : f32
    %406 = vector.broadcast %400 : f32 to vector<8x128xf32>
    %407 = vector.broadcast %cst_132 : f32 to vector<8x128xf32>
    %408 = arith.select %405, %406, %407 : vector<8x128xi1>, vector<8x128xf32>
    %409 = vector.broadcast %396 : f32 to vector<8x128xf32>
    %410 = arith.select %403, %409, %408 : vector<8x128xi1>, vector<8x128xf32>
    %c0_133 = arith.constant 0 : index
    %c0_134 = arith.constant 0 : index
    %c0_135 = arith.constant 0 : index
    %411 = vector.load %arg15[%c0_133, %c0_134, %c0_135] : memref<1x8x128xf32, #tpu.memory_space<vmem>>, vector<1x8x128xf32>
    %412 = vector.shape_cast %411 : vector<1x8x128xf32> to vector<8x128xf32>
    %413 = vector.shape_cast %410 : vector<8x128xf32> to vector<1x8x128xf32>
    tpu.vector_store %arg15[%c0_133, %c0_134, %c0_135], %413 {strides = array<i32>} : memref<1x8x128xf32, #tpu.memory_space<vmem>>, vector<1x8x128xf32>,
    return
  }
  func.func @transform_0(%arg0: i32) -> (i32, i32, i32) {
    %c0_i32 = arith.constant 0 : i32
    %c0_i32_0 = arith.constant 0 : i32
    %c0_i32_1 = arith.constant 0 : i32
    return %arg0, %c0_i32, %c0_i32_0 : i32, i32, i32
  }
  func.func @transform_1(%arg0: i32) -> (i32, i32, i32) {
    %c0_i32 = arith.constant 0 : i32
    %c0_i32_0 = arith.constant 0 : i32
    %c0_i32_1 = arith.constant 0 : i32
    return %arg0, %c0_i32, %c0_i32_0 : i32, i32, i32
  }
  func.func @transform_2(%arg0: i32) -> (i32, i32) {
    %c0_i32 = arith.constant 0 : i32
    %c0_i32_0 = arith.constant 0 : i32
    %c0_i32_1 = arith.constant 0 : i32
    return %c0_i32, %c0_i32_0 : i32, i32
  }
  func.func @transform_3(%arg0: i32) -> (i32, i32) {
    %c0_i32 = arith.constant 0 : i32
    %c0_i32_0 = arith.constant 0 : i32
    %c0_i32_1 = arith.constant 0 : i32
    return %c0_i32, %c0_i32_0 : i32, i32
  }
  func.func @transform_4(%arg0: i32) -> (i32, i32) {
    %c0_i32 = arith.constant 0 : i32
    %c0_i32_0 = arith.constant 0 : i32
    %c0_i32_1 = arith.constant 0 : i32
    return %c0_i32, %c0_i32_0 : i32, i32
  }
  func.func @transform_5(%arg0: i32) -> (i32, i32) {
    %c0_i32 = arith.constant 0 : i32
    %c0_i32_0 = arith.constant 0 : i32
    %c0_i32_1 = arith.constant 0 : i32
    return %c0_i32, %c0_i32_0 : i32, i32
  }
  func.func @transform_6(%arg0: i32) -> (i32, i32) {
    %c0_i32 = arith.constant 0 : i32
    %c0_i32_0 = arith.constant 0 : i32
    %c0_i32_1 = arith.constant 0 : i32
    return %c0_i32, %c0_i32_0 : i32, i32
  }
  func.func @transform_7(%arg0: i32) -> (i32, i32) {
    %c0_i32 = arith.constant 0 : i32
    %c0_i32_0 = arith.constant 0 : i32
    %c0_i32_1 = arith.constant 0 : i32
    return %c0_i32, %c0_i32_0 : i32, i32
  }
  func.func @transform_8(%arg0: i32) -> (i32, i32) {
    %c0_i32 = arith.constant 0 : i32
    %c0_i32_0 = arith.constant 0 : i32
    %c0_i32_1 = arith.constant 0 : i32
    return %c0_i32, %c0_i32_0 : i32, i32
  }
  func.func @transform_9(%arg0: i32) -> (i32, i32) {
    %c0_i32 = arith.constant 0 : i32
    %c0_i32_0 = arith.constant 0 : i32
    %c0_i32_1 = arith.constant 0 : i32
    return %c0_i32, %c0_i32_0 : i32, i32
  }
  func.func @transform_10(%arg0: i32) -> (i32, i32) {
    %c0_i32 = arith.constant 0 : i32
    %c0_i32_0 = arith.constant 0 : i32
    %c0_i32_1 = arith.constant 0 : i32
    return %c0_i32, %c0_i32_0 : i32, i32
  }
  func.func @transform_11(%arg0: i32) -> (i32, i32) {
    %c0_i32 = arith.constant 0 : i32
    %c0_i32_0 = arith.constant 0 : i32
    %c0_i32_1 = arith.constant 0 : i32
    return %c0_i32, %c0_i32_0 : i32, i32
  }
  func.func @transform_12(%arg0: i32) -> (i32, i32) {
    %c0_i32 = arith.constant 0 : i32
    %c0_i32_0 = arith.constant 0 : i32
    %c0_i32_1 = arith.constant 0 : i32
    return %c0_i32, %c0_i32_0 : i32, i32
  }
  func.func @transform_13(%arg0: i32) -> (i32, i32, i32) {
    %c0_i32 = arith.constant 0 : i32
    %c0_i32_0 = arith.constant 0 : i32
    %c0_i32_1 = arith.constant 0 : i32
    return %arg0, %c0_i32, %c0_i32_0 : i32, i32, i32
  }
  func.func @transform_14(%arg0: i32) -> (i32, i32, i32) {
    %c0_i32 = arith.constant 0 : i32
    %c0_i32_0 = arith.constant 0 : i32
    %c0_i32_1 = arith.constant 0 : i32
    return %arg0, %c0_i32, %c0_i32_0 : i32, i32, i32
  }
}

</mosaic_0001>

<bundles_post_ra>
// kernel: bert_lm_pred_forward.1
= control target key start
LH: loop header
LB: loop body
LE: loop exit
PB: predicated region body
PF: predicated region fallthrough
CT: control target
= control target key end

     0   :  { %s3296_s0 = inlined_call_operand.vmem [shape: f32[2,8,32], index: 0, kind: input, shape index: {}]   ;;  %s3297_s1 = inlined_call_operand.vmem [shape: s32[2,8,1], index: 1, kind: input, shape index: {}]   ;;  %s3298_s2 = inlined_call_operand.vmem [shape: f32[26,128], index: 2, kind: input, shape index: {}]   ;;  %s3299_s3 = inlined_call_operand.vmem [shape: bf16[32,384], index: 3, kind: input, shape index: {}]   ;;  %s3300_s4 = inlined_call_operand.vmem [shape: bf16[128,32], index: 4, kind: input, shape index: {}]   ;;  %s3301_s5 = inlined_call_operand.vmem [shape: bf16[32,64], index: 5, kind: input, shape index: {}]   ;;  %s3302_s6 = inlined_call_operand.vmem [shape: bf16[64,32], index: 6, kind: input, shape index: {}]   ;;  %s3303_s7 = inlined_call_operand.vmem [shape: bf16[32,384], index: 7, kind: input, shape index: {}]   ;;  %s3304_s8 = inlined_call_operand.vmem [shape: bf16[128,32], index: 8, kind: input, shape index: {}]   ;;  %s3305_s9 = inlined_call_operand.vmem [shape: bf16[32,64], index: 9, kind: input, shape index: {}]   ;;  %s3306_s10 = inlined_call_operand.vmem [shape: bf16[64,32], index: 10, kind: input, shape index: {}]   ;;  %s3307_s11 = inlined_call_operand.vmem [shape: bf16[32,32], index: 11, kind: input, shape index: {}]   ;;  %s3308_s12 = inlined_call_operand.vmem [shape: bf16[32,128], index: 12, kind: input, shape index: {}]   ;;  %s3309_s13 = inlined_call_operand.hbm [shape: f32[2,8,128], index: 13, kind: output, shape index: {0}]   ;;  %s3310_s14 = inlined_call_operand.vmem [shape: f32[2,8,128], index: 14, kind: output, shape index: {1}]  }
   0x1   :  { %3311 = sst [smem:[#allocation6_spill]] %s3296_s0 }
   0x2   :  { %3312 = sst [smem:[#allocation7_spill]] %s3297_s1 }
   0x3   :  { %3313 = sst [smem:[#allocation8_spill]] %s3298_s2 }
   0x4   :  { %3314 = sst [smem:[#allocation9_spill]] %s3299_s3 }
   0x5   :  { %3315 = sst [smem:[#allocation10_spill]] %s3300_s4 }
   0x6   :  { %20 = vsyncpa [#allocation3], 0 }
   0x7   :  { %22 = vsyncpa [#allocation3 + $0x1], 0  ;;  %s2805_s29 = smov 0   ;;  %s2807_s30 = smov 0  }
   0x8   :  { %s2809_s15 = smov 0   ;;  %s2811_s16 = smov 0  }
   0x9 LB: > { %s2826_s17 = sadd.s32 4294967295, %s2724_s16   ;;  %s2199_s18 = sadd.s32 4294967294, %s2724_s16   ;;  %s2724_s16 = sphi %s2811_s16, %s3328_s16   ;;  %s2720_s15 = sphi %s2809_s15, %s3327_s15   ;;  %s2716_s30 = sphi %s2807_s30, %s3326_s30   ;;  %s2712_s29 = sphi %s2805_s29, %s3325_s29  }
   0xa   : > { %s2830_s19 = sadd.s32 1, %s2724_s16   ;;  %s318_s20 = sadd.s32 1, %s2720_s15 }
   0xb   : > { %s315_s21 = ssub.s32 %s2724_s16, %s2830_s19  ;;  %p328_p0 = scmp.ne.s32.totalorder %s2720_s15, %s2716_s30 }
   0xc   : > { %p316_p1 = scmp.eq.s32.totalorder %s315_s21, 0  ;;  %p329_p2 = scmp.eq.s32.totalorder %s2826_s17, 1 }
   0xd   : > { %p334_p3 = scmp.ne.s32.totalorder %s2716_s30, %s2712_s29  ;;  %p335_p4 = scmp.eq.s32.totalorder %s2199_s18, 1 }
   0xe   : > { %s2841_s22 = scalar_select %p316_p1, %s2720_s15, %s318_s20  }
   0xf   : > { %p2843_p5 = por %p329_p2, %p328_p0  ;;  %p2847_p6 = por %p335_p4, %p334_p3 }
  0x10   : > { %3316 = sst [smem:[#allocation5_spill]] %s2841_s22  ;;  %p2202_p7 = scmp.ge.s32.totalorder %s2724_s16, 1 }
  0x11   : > { %p426_p8 = scmp.lt.s32.totalorder %s2724_s16, 3 }
  0x13   : > { %p427_p9 = pnand %p2202_p7, %p426_p8 }
  0x14   : > { %p479_p10 = scmp.lt.s32.totalorder (!%p427_p9), %s2826_s17, 1  ;;  %vm509_vm0 = vcmask (!%p427_p9), 261120   ;;  %s3319_s0 = sld [smem:[#allocation6_spill]] (!%p427_p9)  ;;  %v2726_v10 = vmov (!%p427_p9), 0.0   ;;  %v2727_v14 = vmov (!%p427_p9), 0   ;;  %vm2728_vm1 = vmmov (!%p427_p9), 0  }
  0x15   : > { %430 = sbr.rel (%p427_p9) target bundleno = 6216 (0x1848), region = 72  ;;  %s3320_s3 = sld [smem:[#allocation9_spill]] (!%p427_p9)  ;;  %2360 = vmatprep.subr.bf16.mxu1 (!%p427_p9), %v2726_v10  ;;  %610 = vmatprep.mubr.bf16.mxu0 (!%p427_p9), %v2727_v14  ;;  %v492_v25 = vlaneseq (!%p427_p9)  ;;  %vm794_vm6 = vcmask (!%p427_p9), 1043456   ;;  %vm720_vm7 = vcmask (!%p427_p9), 64512   ;;  %vm1132_vm8 = vcmask (!%p427_p9), 523264  }
  0x16   : > { %2364 = vmatprep.mubr.msk.bf16.mxu1 (!%p427_p9), %vm2728_vm1, %v2726_v10  ;;  %2574 = vset.pattern.permute.xlu1 (!%p427_p9), %v2727_v14  ;;  %s3321_s2 = sld [smem:[#allocation8_spill]] (!%p427_p9)  ;;  %s3322_s4 = sld [smem:[#allocation10_spill]] (!%p427_p9)  ;;  %vm2055_vm11 = vcmask (!%p427_p9), 7168  }
  0x17   : > { %2575 = vset.pattern.permute.xlu0 (!%p427_p9), %v2727_v14  ;;  %v2906_v26 = vand.u32 (!%p427_p9), 127, %v492_v25  ;;  %s3323_s1 = sld [smem:[#allocation7_spill]] (!%p427_p9)  ;;  %s470_s27 = sand.u32 (!%p427_p9), 1, %s2716_s30  }
  0x18   : > { %s2729_s28 = smov (!%p427_p9), [#allocation2]  }
  0x19   : > { %vm499_vm2 = vcmp.ge.s32.totalorder (!%p427_p9), %v2906_v26, 16  ;;  %vm500_vm3 = vcmp.lt.s32.totalorder (!%p427_p9), %v2906_v26, 32  ;;  %vm495_vm4 = vcmp.lt.s32.totalorder (!%p427_p9), %v2906_v26, 16 }
  0x1a   : > { %vm501_vm5 = vmand (!%p427_p9), %vm499_vm2, %vm500_vm3  ;;  %v2918_v29 = vsel (!%p427_p9), %vm495_vm4, 1.0, %v2726_v10 }
  0x1b   : > { %v2576_v7 = vld [vmem:[%s3320_s3 + $0x4] ss:$12 sps:$4 sm:$0xff] (!%p427_p9)   ;;  %v2578_v8 = vld [vmem:[%s3320_s3] ss:$12 sps:$4 sm:$0xff] (!%p427_p9)   ;;  %v2579_v9 = vld [vmem:[%s3320_s3 + $0x8] ss:$12 sps:$4 sm:$0xff] (!%p427_p9)  }
  0x1c   : > { %s480_s25 = scalar_select %p479_p10, %s2826_s17, 1  ;;  %578 = vmatprep.subr.bf16.mxu0 %v2576_v7  ;;  %v2580_v11 = vld [vmem:[%s3320_s3 + $0x1c] ss:$12 sps:$4 sm:$0xff]   ;;  %2361 = vmatpush3.bf16.msra.mxu1 %v2579_v9  ;;  %v2582_v12 = vld [vmem:[%s3320_s3 + $0x18] ss:$12 sps:$4 sm:$0xff]   ;;  %v2921_v30 = vsel %vm501_vm5, 1.0, %v2726_v10 }
  0x1d   : > { %579 = vmatpush1.bf16.msra.mxu0 %v2578_v8  ;;  %v2583_v13 = vld [vmem:[%s3320_s3 + $0x20] ss:$12 sps:$4 sm:$0xff]   ;;  %2362 = vmatprep.subr.bf16.mxu1 %v2726_v10  ;;  %v2221_v27 = vld [vmem:[%s3321_s2 + $0x8] ss:$0 sm:$0xff]  ;;  %v2220_v28 = vld [vmem:[%s3321_s2 + $0x7] ss:$0 sm:$0xff] }
  0x1e   : > { %s2855_s26 = sshll.u32 %s480_s25, 3  ;;  %580 = vmatprep.subr.bf16.mxu0 %v2580_v11  ;;  %v2209_v19 = vld [vmem:[%s3321_s2] ss:$0 sm:$0xff]  ;;  %v2210_v21 = vld [vmem:[%s3321_s2 + $0x1] ss:$0 sm:$0xff]  ;;  %v2929_v40 = vmul.f32 0.25, %v2918_v29 }
  0x1f   : > { %s482_s18 = scalar_lea.vmem %s3319_s0, %s2855_s26  ;;  %v2219_v32 = vld [vmem:[%s3321_s2 + $0x6] ss:$0 sm:$0xff]  ;;  %v2932_v41 = vmul.f32 0.25, %v2921_v30  ;;  %v2585_v11 = vld [vmem:[%s3322_s4 + $0x8] sm:$0xff]   ;;  %s486_s20 = scalar_lea.vmem %s3323_s1, %s2855_s26 }
  0x20   : > { %v506_v0 = vld [vmem:[%s482_s18] sm:$0xff]  ;;  %2363 = vmatpush3.bf16.msra.mxu1 %v2583_v13  ;;  %v2587_v13 = vld [vmem:[%s3322_s4 + $0x18] sm:$0xff]   ;;  %s3240_s3 = sshll.u32 %s470_s27, 3  ;;  %s2666_s1 = sshll.u32 %s2729_s28, 4  ;;  %s2667_s1 = int_to_ptr.vmem [resolvable:$false] %s2666_s1 }
  0x21   : > { %v510_v1 = vsel %vm509_vm0, %v506_v0, 0.0  ;;  %581 = vmatpush1.bf16.msra.mxu0 %v2582_v12  ;;  %2374 = vmatprep.subr.bf16.mxu1 %v2726_v10  ;;  %v2584_v9 = vld [vmem:[%s3322_s4] sm:$0xff]   ;;  %v2586_v12 = vld [vmem:[%s3322_s4 + $0x10] sm:$0xff]   ;;  %s472_s18 = scalar_lea.vmem [#allocation2], %s3240_s3  ;;  %s2084_s3 = scalar_lea.sflag [#allocation3], %s470_s27 }
  0x22   : > { %511 = vadd.xlane.f32.xlu0 %v510_v1  ;;  %2368 = vmatprep.subr.bf16.mxu0 %v2726_v10  ;;  %s2101_s21 = sshll.u32 %s472_s18, 4  ;;  %s2102_s21 = int_to_ptr.vmem [resolvable:$true] %s2101_s21 }
  0x23   : > { %p2669_p0 = scmp.lt.s32.totalorder %s2102_s21, %s2667_s1 }
  0xaf   : > { %v512_v2 = vpop.xlane.xlu0 %511 }
  0xb0   : > { %v514_v3 = vmul.f32 0.03125, %v512_v2 }
  0xb2   : > { %v515_v4 = vsub.f32 %v506_v0, %v514_v3 }
  0xb4   : > { %v516_v5 = vmul.f32 %v515_v4, %v515_v4 }
  0xb6   : > { %v517_v6 = vsel %vm509_vm0, %v516_v5, 0.0 }
  0xb7   : > { %518 = vadd.xlane.f32.xlu0 %v517_v6 }
 0x144   : > { %v519_v15 = vpop.xlane.xlu0 %518 }
 0x145   : > { %v520_v16 = vmul.f32 0.03125, %v519_v15  ;;  %v2588_v15 = vld [vmem:[%s3322_s4 + $0x20] sm:$0xff]  }
 0x147   : > { %v521_v17 = vadd.f32 1e-12, %v520_v16  ;;  %v2589_v16 = vld [vmem:[%s3322_s4 + $0x28] sm:$0xff]  }
 0x149   : > { %2624 = vrsqrt.f32 %v521_v17  ;;  %v2590_v17 = vld [vmem:[%s3322_s4 + $0x30] sm:$0xff]  }
 0x153   : > { %v2625_v18 = vpop.eup %2624 }
 0x154   : > { %v523_v20 = vmul.f32 %v2625_v18, %v515_v4 }
 0x156   : > { %v528_v22 = vmul.f32 %v2209_v19, %v523_v20 }
 0x158   : > { %v2896_v23 = vadd.f32 %v2210_v21, %v528_v22 }
 0x15a   : > { %v534_v24 = vpack.c.bf16 %v2896_v23, %v2896_v23 }
 0x15c   : > { %2217 = vmatmul.mubr.msk.bf16.vlgmr.msra.gmra.mrb[0].mxu0 %vm509_vm0, %v534_v24  ;;  %2365 = vmatmul.mubr.msk.bf16.vlgmr.msra.gmra.mrb[0].mxu1 %vm509_vm0, %v534_v24 }
 0x15d   : > { %2370 = vmatprep.mubr.msk.bf16.mxu0 %vm2728_vm1, %v2726_v10  ;;  %2376 = vmatprep.mubr.msk.bf16.mxu1 %vm2728_vm1, %v2726_v10 }
 0x22f   : > { %v612_v31 = vpop.f32.mrb[0].mxu0  ;;  %v653_v33 = vpop.f32.mrb[0].mxu1 }
 0x230   : > { %v2926_v34 = vadd.f32 %v2221_v27, %v653_v33  ;;  %v614_v35 = vpop.f32.mrb[1].mxu0  ;;  %v2366_v36 = vpop.f32.mrb[1].mxu1  ;;  %v664_v42 = vadd.f32 %v2219_v32, %v612_v31  ;;  %v2591_v33 = vld [vmem:[%s3322_s4 + $0x38] sm:$0xff]   ;;  %s2662_s4 = scalar_lea.vmem %s2102_s21, 128 }
 0x231   : > { %v670_v37 = vadd.f32 %v2220_v28, %v614_v35  ;;  %v616_v38 = vpop.f32.mrb[2].mxu0  ;;  %v656_v39 = vpop.f32.mrb[2].mxu1  ;;  %p2663_p11 = scmp.ne.s32.totalorder %s2102_s21, %s2662_s4 }
 0x232   : > { %v617_v43 = vpop.f32.mrb[3].mxu0  ;;  %v2367_v44 = vpop.f32.mrb[3].mxu1  ;;  %v788_v46 = vmul.f32 %v2921_v30, %v2926_v34  ;;  %v678_v47 = vmul.f32 %v664_v42, %v2929_v40  ;;  %v735_v48 = vmul.f32 %v664_v42, %v2932_v41  ;;  %v732_v20 = vmul.f32 %v2918_v29, %v2926_v34  ;;  %v2224_v39 = vld [vmem:[%s3321_s2 + $0x9] ss:$0 sm:$0xff] }
 0x233   : > { %v677_v45 = vpack.c.bf16 %v670_v37, %v670_v37  ;;  %p2664_p12 = pnand %p2663_p11, %p2843_p5 }
 0x234   : > { %v789_v49 = vpack.c.bf16 %v788_v46, %v788_v46  ;;  %v679_v50 = vpack.c.bf16 %v678_v47, %v678_v47  ;;  %v736_v51 = vpack.c.bf16 %v735_v48, %v735_v48  ;;  %v733_v22 = vpack.c.bf16 %v732_v20, %v732_v20 }
 0x235   : > { %2369 = vmatpush3.bf16.xpose.msra.mxu0 %v677_v45  ;;  %2375 = vmatpush3.bf16.xpose.msra.mxu1 %v677_v45  ;;  %p2665_p13 = pneg %p2664_p12 }
 0x236   : > { %2380 = vmatprep.subr.bf16.mxu0 %v2726_v10  ;;  %2392 = vmatprep.subr.bf16.mxu1 %v2726_v10  ;;  %v796_v52 = vsel %vm794_vm6, %v789_v49, 0  ;;  %v842_v27 = vsel %vm794_vm6, %v733_v22, 0  ;;  %v2239_v22 = vld [vmem:[%s3321_s2 + $0xd] ss:$0 sm:$0xff] }
 0x23c   : > { %2371 = vmatmul.mubr.bf16.vlgmr.msra.gmra.mrb[4].mxu0 %v679_v50  ;;  %2377 = vmatmul.mubr.bf16.vlgmr.msra.gmra.mrb[4].mxu1 %v736_v51 }
 0x23d   : > { %2381 = vmatpush3.bf16.msra.mxu0 %v796_v52  ;;  %2382 = vmatprep.mubr.msk.bf16.mxu0 %vm2728_vm1, %v2726_v10 }
 0x23e   : > { %2386 = vmatprep.subr.bf16.mxu0 %v2726_v10  ;;  %2408 = vmatprep.mubr.msk.bf16.mxu1 %vm2728_vm1, %v2726_v10 }
 0x23f   : > { %2393 = vmatpush3.bf16.msra.mxu1 %v2584_v9 }
 0x240   : > { %2394 = vmatprep.subr.bf16.mxu1 %v2726_v10 }
 0x243   : > { %2395 = vmatpush3.bf16.msra.mxu1 %v2585_v11 }
 0x244   : > { %2396 = vmatprep.subr.bf16.mxu1 %v2726_v10 }
 0x247   : > { %2397 = vmatpush3.bf16.msra.mxu1 %v2586_v12 }
 0x248   : > { %2398 = vmatprep.subr.bf16.mxu1 %v2726_v10 }
 0x24b   : > { %2399 = vmatpush3.bf16.msra.mxu1 %v2587_v13 }
 0x24c   : > { %2400 = vmatprep.subr.bf16.mxu1 %v2726_v10 }
 0x24f   : > { %2401 = vmatpush3.bf16.msra.mxu1 %v2588_v15 }
 0x250   : > { %2402 = vmatprep.subr.bf16.mxu1 %v2726_v10 }
 0x253   : > { %2403 = vmatpush3.bf16.msra.mxu1 %v2589_v16 }
 0x254   : > { %2404 = vmatprep.subr.bf16.mxu1 %v2726_v10 }
 0x257   : > { %2405 = vmatpush3.bf16.msra.mxu1 %v2590_v17 }
 0x258   : > { %2406 = vmatprep.subr.bf16.mxu1 %v2726_v10 }
 0x25b   : > { %2407 = vmatpush3.bf16.msra.mxu1 %v2591_v33 }
 0x30f   : > { %v714_v53 = vpop.f32.mrb[4].mxu0  ;;  %v771_v54 = vpop.f32.mrb[4].mxu1 }
 0x310   : > { %v2372_v55 = vpop.f32.mrb[5].mxu0  ;;  %v2378_v56 = vpop.f32.mrb[5].mxu1  ;;  %v777_v57 = vsel %vm720_vm7, %v771_v54, -inf  ;;  %v721_v62 = vsel %vm720_vm7, %v714_v53, -inf }
 0x311   : > { %778 = vmax.xlane.f32.xlu1 %v777_v57  ;;  %v717_v58 = vpop.f32.mrb[6].mxu0  ;;  %v774_v59 = vpop.f32.mrb[6].mxu1 }
 0x312   : > { %v2373_v60 = vpop.f32.mrb[7].mxu0  ;;  %v2379_v61 = vpop.f32.mrb[7].mxu1  ;;  %v2233_v58 = vld [vmem:[%s3321_s2 + $0xa] ss:$0 sm:$0xff] }
 0x313   : > { %v2234_v60 = vld [vmem:[%s3321_s2 + $0xb] ss:$0 sm:$0xff] }
 0x315   : > { %722 = vmax.xlane.f32.xlu1 %v721_v62 }
 0x39e   : > { %v779_v63 = vpop.xlane.xlu1 %778 }
 0x39f   : > { %v780_v0 = vsub.f32 %v771_v54, %v779_v63  ;;  %v2593_v54 = vld [vmem:[%s3301_s5 + $0x8] sm:$0xff]  }
 0x3a1   : > { %v781_v1 = vmul.f32 1.442695, %v780_v0  ;;  %v2594_v0 = vld [vmem:[%s3302_s6] sm:$0xff]  }
 0x3a2   : > { %v723_v2 = vpop.xlane.xlu1 %722 }
 0x3a3   : > { %2626 = vpow2.f32 %v781_v1  ;;  %v724_v3 = vsub.f32 %v714_v53, %v723_v2  ;;  %v2592_v53 = vld [vmem:[%s3301_s5] sm:$0xff]   ;;  %v2595_v1 = vld [vmem:[%s3302_s6 + $0x8] sm:$0xff]   ;;  %v2596_v2 = vld [vmem:[%s3302_s6 + $0x10] sm:$0xff]  }
 0x3a5   : > { %v725_v4 = vmul.f32 1.442695, %v724_v3  ;;  %v2597_v3 = vld [vmem:[%s3302_s6 + $0x18] sm:$0xff]  }
 0x3a7   : > { %2628 = vpow2.f32 %v725_v4  ;;  %v2235_v4 = vld [vmem:[%s3321_s2 + $0xc] ss:$0 sm:$0xff] }
 0x3ad   : > { %v2627_v5 = vpop.eup %2626 }
 0x3ae   : > { %v783_v6 = vsel %vm720_vm7, %v2627_v5, 0.0 }
 0x3af   : > { %784 = vadd.xlane.f32.xlu0 %v783_v6 }
 0x3b1   : > { %v2629_v7 = vpop.eup %2628 }
 0x3b2   : > { %v727_v8 = vsel %vm720_vm7, %v2629_v7, 0.0 }
 0x3b3   : > { %728 = vadd.xlane.f32.xlu1 %v727_v8 }
 0x43c   : > { %v785_v18 = vpop.xlane.xlu0 %784 }
 0x43d   : > { %2630 = vrcp.f32 %v785_v18 }
 0x440   : > { %v729_v19 = vpop.xlane.xlu1 %728 }
 0x441   : > { %2632 = vrcp.f32 %v729_v19 }
 0x447   : > { %v2631_v21 = vpop.eup %2630 }
 0x448   : > { %v787_v24 = vmul.f32 %v2631_v21, %v2627_v5 }
 0x44a   : > { %v790_v25 = vpack.c.bf16 %v787_v24, %v787_v24 }
 0x44b   : > { %v2633_v28 = vpop.eup %2632 }
 0x44c   : > { %2383 = vmatmul.mubr.msk.bf16.vlgmr.msra.gmra.mrb[8].mxu0 %vm720_vm7, %v790_v25  ;;  %v731_v31 = vmul.f32 %v2633_v28, %v2629_v7 }
 0x44d   : > { %2387 = vmatpush3.bf16.msra.mxu0 %v842_v27  ;;  %2388 = vmatprep.mubr.msk.bf16.mxu0 %vm2728_vm1, %v2726_v10 }
 0x44e   : > { %2412 = vmatprep.subr.bf16.mxu0 %v2726_v10  ;;  %v734_v32 = vpack.c.bf16 %v731_v31, %v731_v31 }
 0x458   : > { %2389 = vmatmul.mubr.msk.bf16.vlgmr.msra.gmra.mrb[8].mxu0 %vm720_vm7, %v734_v32 }
 0x459   : > { %2416 = vmatprep.mubr.msk.bf16.mxu0 %vm2728_vm1, %v2726_v10  ;;  %2413 = vmatpush3.bf16.msra.mxu0 %v2592_v53 }
 0x45a   : > { %2414 = vmatprep.subr.bf16.mxu0 %v2726_v10 }
 0x45d   : > { %2415 = vmatpush3.bf16.msra.mxu0 %v2593_v54 }
 0x45e   : > { %2420 = vmatprep.subr.bf16.mxu0 %v2726_v10 }
 0x52b   : > { %v878_v34 = vpop.f32.mrb[8].mxu0 }
 0x52c   : > { %v884_v35 = vpack.c.bf16 %v878_v34, %v878_v34  ;;  %v2390_v36 = vpop.f32.mrb[9].mxu0 }
 0x52d   : > { %v881_v37 = vpop.f32.mrb[10].mxu0 }
 0x52e   : > { %v2391_v38 = vpop.f32.mrb[11].mxu0  ;;  %2409 = vmatmul.mubr.bf16.vlgmr.msra.gmra.mrb[8].mxu1 %v884_v35 }
 0x52f   : > { %1278 = vmatprep.mubr.bf16.mxu1 %v2727_v14 }
 0x601   : > { %v988_v42 = vpop.f32.mrb[8].mxu1 }
 0x602   : > { %v989_v43 = vadd.f32 %v2224_v39, %v988_v42  ;;  %v2410_v44 = vpop.f32.mrb[9].mxu1  ;;  %v2600_v39 = vld [vmem:[%s3303_s7 + $0x4] ss:$12 sps:$4 sm:$0xff]   ;;  %v2598_v42 = vld [vmem:[%s3303_s7] ss:$12 sps:$4 sm:$0xff]  }
 0x603   : > { %v991_v45 = vpop.f32.mrb[10].mxu1  ;;  %1246 = vmatprep.subr.bf16.mxu1 %v2600_v39  ;;  %v2602_v44 = vld [vmem:[%s3303_s7 + $0x18] ss:$12 sps:$4 sm:$0xff]  }
 0x604   : > { %v2411_v46 = vpop.f32.mrb[11].mxu1  ;;  %v994_v47 = vadd.f32 %v989_v43, %v2896_v23  ;;  %v2601_v43 = vld [vmem:[%s3303_s7 + $0x8] ss:$12 sps:$4 sm:$0xff]   ;;  %1247 = vmatpush1.bf16.msra.mxu1 %v2598_v42  ;;  %v2609_v39 = vld [vmem:[%s3304_s8 + $0x18] sm:$0xff]   ;;  %v2610_v42 = vld [vmem:[%s3304_s8 + $0x20] sm:$0xff]  }
 0x605   : > { %v2604_v45 = vld [vmem:[%s3303_s7 + $0x1c] ss:$12 sps:$4 sm:$0xff]   ;;  %v2605_v46 = vld [vmem:[%s3303_s7 + $0x20] ss:$12 sps:$4 sm:$0xff]  }
 0x606   : > { %v997_v48 = vsel %vm509_vm0, %v994_v47, 0.0  ;;  %1248 = vmatprep.subr.bf16.mxu1 %v2604_v45 }
 0x607   : > { %998 = vadd.xlane.f32.xlu0 %v997_v48 }
 0x608   : > { %1249 = vmatpush1.bf16.msra.mxu1 %v2602_v44  ;;  %v2612_v44 = vld [vmem:[%s3304_s8 + $0x30] sm:$0xff]  }
 0x609   : > { %2440 = vmatprep.subr.bf16.mxu1 %v2726_v10 }
 0x694   : > { %v999_v49 = vpop.xlane.xlu0 %998 }
 0x695   : > { %v1000_v50 = vmul.f32 0.03125, %v999_v49 }
 0x697   : > { %v1001_v51 = vsub.f32 %v994_v47, %v1000_v50 }
 0x699   : > { %v1002_v52 = vmul.f32 %v1001_v51, %v1001_v51 }
 0x69b   : > { %v1003_v14 = vsel %vm509_vm0, %v1002_v52, 0.0 }
 0x69c   : > { %1004 = vadd.xlane.f32.xlu1 %v1003_v14  ;;  %v2246_v14 = vld [vmem:[%s3321_s2 + $0xf] ss:$0 sm:$0xff] }
 0x729   : > { %v1005_v23 = vpop.xlane.xlu1 %1004 }
 0x72a   : > { %v1006_v55 = vmul.f32 0.03125, %v1005_v23 }
 0x72c   : > { %v1007_v56 = vadd.f32 1e-12, %v1006_v55  ;;  %v2257_v55 = vld [vmem:[%s3321_s2 + $0x12] ss:$0 sm:$0xff] }
 0x72e   : > { %2634 = vrsqrt.f32 %v1007_v56  ;;  %v2256_v56 = vld [vmem:[%s3321_s2 + $0x11] ss:$0 sm:$0xff] }
 0x738   : > { %v2635_v57 = vpop.eup %2634 }
 0x739   : > { %v1009_v59 = vmul.f32 %v2635_v57, %v1001_v51  ;;  %v2245_v51 = vld [vmem:[%s3321_s2 + $0xe] ss:$0 sm:$0xff] }
 0x73b   : > { %v1014_v61 = vmul.f32 %v2233_v58, %v1009_v59  ;;  %v2255_v58 = vld [vmem:[%s3321_s2 + $0x10] ss:$0 sm:$0xff] }
 0x73d   : > { %v1019_v62 = vadd.f32 %v2234_v60, %v1014_v61 }
 0x73f   : > { %v1020_v63 = vpack.c.bf16 %v1019_v62, %v1019_v62 }
 0x741   : > { %2417 = vmatmul.mubr.msk.bf16.vlgmr.msra.gmra.mrb[12].mxu0 %vm509_vm0, %v1020_v63 }
 0x742   : > { %2428 = vmatprep.mubr.msk.bf16.mxu0 %vm2728_vm1, %v2726_v10  ;;  %2421 = vmatpush3.bf16.msra.mxu0 %v2594_v0 }
 0x743   : > { %2422 = vmatprep.subr.bf16.mxu0 %v2726_v10 }
 0x746   : > { %2423 = vmatpush3.bf16.msra.mxu0 %v2595_v1 }
 0x747   : > { %2424 = vmatprep.subr.bf16.mxu0 %v2726_v10 }
 0x74a   : > { %2425 = vmatpush3.bf16.msra.mxu0 %v2596_v2 }
 0x74b   : > { %2426 = vmatprep.subr.bf16.mxu0 %v2726_v10 }
 0x74e   : > { %2427 = vmatpush3.bf16.msra.mxu0 %v2597_v3 }
 0x74f   : > { %2432 = vmatprep.subr.bf16.mxu0 %v2726_v10 }
 0x814   : > { %v1079_v5 = vpop.f32.mrb[12].mxu0 }
 0x815   : > { %v1080_v6 = vadd.f32 %v2235_v4, %v1079_v5  ;;  %v2418_v7 = vpop.f32.mrb[13].mxu0 }
 0x816   : > { %v1082_v8 = vpop.f32.mrb[14].mxu0 }
 0x817   : > { %v1085_v9 = vmul.f32 %v1080_v6, %v1080_v6  ;;  %v2419_v11 = vpop.f32.mrb[15].mxu0 }
 0x819   : > { %v1086_v12 = vmul.f32 %v1085_v9, %v1080_v6 }
 0x81b   : > { %v1087_v13 = vmul.f32 0.044715, %v1086_v12 }
 0x81d   : > { %v1088_v15 = vadd.f32 %v1087_v13, %v1080_v6 }
 0x81f   : > { %v1089_v16 = vmul.f32 0.7978846, %v1088_v15 }
 0x821   : > { %2636 = vtanh.f32 %v1089_v16 }
 0x82b   : > { %v2637_v17 = vpop.eup %2636 }
 0x82c   : > { %v1091_v18 = vadd.f32 1.0, %v2637_v17 }
 0x82e   : > { %v1092_v19 = vmul.f32 0.5, %v1091_v18 }
 0x830   : > { %v1093_v20 = vmul.f32 %v1092_v19, %v1080_v6 }
 0x832   : > { %v1094_v21 = vpack.c.bf16 %v1093_v20, %v1093_v20 }
 0x834   : > { %2429 = vmatmul.mubr.msk.bf16.vlgmr.msra.gmra.mrb[16].mxu0 %vm1132_vm8, %v1094_v21 }
 0x835   : > { %2436 = vmatprep.mubr.msk.bf16.mxu0 %vm2728_vm1, %v2726_v10  ;;  %2433 = vmatpush3.bf16.msra.mxu0 %v2601_v43  ;;  %v2611_v43 = vld [vmem:[%s3304_s8 + $0x28] sm:$0xff]  }
 0x836   : > { %2434 = vmatprep.subr.bf16.mxu0 %v2726_v10 }
 0x839   : > { %2435 = vmatpush3.bf16.msra.mxu0 %v2605_v46 }
 0x83a   : > { %2446 = vmatprep.subr.bf16.mxu0 %v2726_v10 }
 0x907   : > { %v1170_v24 = vpop.f32.mrb[16].mxu0 }
 0x908   : > { %v1171_v25 = vadd.f32 %v2239_v22, %v1170_v24  ;;  %v2430_v27 = vpop.f32.mrb[17].mxu0 }
 0x909   : > { %v1173_v28 = vpop.f32.mrb[18].mxu0 }
 0x90a   : > { %v2431_v31 = vpop.f32.mrb[19].mxu0  ;;  %v1176_v32 = vadd.f32 %v1171_v25, %v1019_v62 }
 0x90c   : > { %v1179_v33 = vsel %vm509_vm0, %v1176_v32, 0.0 }
 0x90d   : > { %1180 = vadd.xlane.f32.xlu0 %v1179_v33 }
 0x99a   : > { %v1181_v34 = vpop.xlane.xlu0 %1180 }
 0x99b   : > { %v1182_v35 = vmul.f32 0.03125, %v1181_v34 }
 0x99d   : > { %v1183_v36 = vsub.f32 %v1176_v32, %v1182_v35 }
 0x99f   : > { %v1184_v37 = vmul.f32 %v1183_v36, %v1183_v36 }
 0x9a1   : > { %v1185_v38 = vsel %vm509_vm0, %v1184_v37, 0.0  ;;  %v2607_v37 = vld [vmem:[%s3304_s8 + $0x8] sm:$0xff]  }
 0x9a2   : > { %1186 = vadd.xlane.f32.xlu1 %v1185_v38  ;;  %v2608_v38 = vld [vmem:[%s3304_s8 + $0x10] sm:$0xff]  }
 0xa2f   : > { %v1187_v47 = vpop.xlane.xlu1 %1186 }
 0xa30   : > { %v1188_v48 = vmul.f32 0.03125, %v1187_v47 }
 0xa32   : > { %v1189_v49 = vadd.f32 1e-12, %v1188_v48 }
 0xa34   : > { %2638 = vrsqrt.f32 %v1189_v49 }
 0xa3e   : > { %v2639_v50 = vpop.eup %2638 }
 0xa3f   : > { %v1191_v52 = vmul.f32 %v2639_v50, %v1183_v36  ;;  %v2606_v36 = vld [vmem:[%s3304_s8] sm:$0xff]  }
 0xa41   : > { %v1196_v53 = vmul.f32 %v2245_v51, %v1191_v52 }
 0xa43   : > { %v3069_v54 = vadd.f32 %v2246_v14, %v1196_v53 }
 0xa45   : > { %v1202_v23 = vpack.c.bf16 %v3069_v54, %v3069_v54 }
 0xa47   : > { %2253 = vmatmul.mubr.msk.bf16.vlgmr.msra.gmra.mrb[12].mxu1 %vm509_vm0, %v1202_v23  ;;  %2437 = vmatmul.mubr.msk.bf16.vlgmr.msra.gmra.mrb[20].mxu0 %vm509_vm0, %v1202_v23 }
 0xa48   : > { %2442 = vmatprep.mubr.msk.bf16.mxu1 %vm2728_vm1, %v2726_v10  ;;  %2448 = vmatprep.mubr.msk.bf16.mxu0 %vm2728_vm1, %v2726_v10 }
 0xb1a   : > { %v1280_v57 = vpop.f32.mrb[12].mxu1  ;;  %v1321_v59 = vpop.f32.mrb[20].mxu0 }
 0xb1b   : > { %v3088_v60 = vadd.f32 %v2257_v55, %v1321_v59  ;;  %v1282_v61 = vpop.f32.mrb[13].mxu1  ;;  %v2438_v62 = vpop.f32.mrb[21].mxu0  ;;  %v1332_v2 = vadd.f32 %v2255_v58, %v1280_v57 }
 0xb1c   : > { %v1338_v63 = vadd.f32 %v2256_v56, %v1282_v61  ;;  %v1284_v0 = vpop.f32.mrb[14].mxu1  ;;  %v1324_v1 = vpop.f32.mrb[22].mxu0 }
 0xb1d   : > { %v1285_v3 = vpop.f32.mrb[15].mxu1  ;;  %v2439_v4 = vpop.f32.mrb[23].mxu0  ;;  %v1455_v6 = vmul.f32 %v2921_v30, %v3088_v60  ;;  %v1346_v7 = vmul.f32 %v1332_v2, %v2929_v40  ;;  %v1402_v8 = vmul.f32 %v1332_v2, %v2932_v41  ;;  %v1399_v47 = vmul.f32 %v2918_v29, %v3088_v60  ;;  %v2613_v29 = vld [vmem:[%s3304_s8 + $0x38] sm:$0xff]   ;;  %v2260_v60 = vld [vmem:[%s3321_s2 + $0x13] ss:$0 sm:$0xff] }
 0xb1e   : > { %v1345_v5 = vpack.c.bf16 %v1338_v63, %v1338_v63 }
 0xb1f   : > { %v1456_v9 = vpack.c.bf16 %v1455_v6, %v1455_v6  ;;  %v1347_v11 = vpack.c.bf16 %v1346_v7, %v1346_v7  ;;  %v1403_v12 = vpack.c.bf16 %v1402_v8, %v1402_v8  ;;  %v1400_v49 = vpack.c.bf16 %v1399_v47, %v1399_v47 }
 0xb20   : > { %2441 = vmatpush3.bf16.xpose.msra.mxu1 %v1345_v5  ;;  %2447 = vmatpush3.bf16.xpose.msra.mxu0 %v1345_v5 }
 0xb21   : > { %2452 = vmatprep.subr.bf16.mxu1 %v2726_v10  ;;  %2464 = vmatprep.subr.bf16.mxu0 %v2726_v10  ;;  %v1462_v13 = vsel %vm794_vm6, %v1456_v9, 0  ;;  %v1508_v52 = vsel %vm794_vm6, %v1400_v49, 0  ;;  %v2614_v9 = vld [vmem:[%s3305_s9] sm:$0xff]  }
 0xb27   : > { %2443 = vmatmul.mubr.bf16.vlgmr.msra.gmra.mrb[16].mxu1 %v1347_v11  ;;  %2449 = vmatmul.mubr.bf16.vlgmr.msra.gmra.mrb[24].mxu0 %v1403_v12  ;;  %v2615_v11 = vld [vmem:[%s3305_s9 + $0x8] sm:$0xff]  }
 0xb28   : > { %2453 = vmatpush3.bf16.msra.mxu1 %v1462_v13  ;;  %2454 = vmatprep.mubr.msk.bf16.mxu1 %vm2728_vm1, %v2726_v10 }
 0xb29   : > { %2458 = vmatprep.subr.bf16.mxu1 %v2726_v10  ;;  %2480 = vmatprep.mubr.msk.bf16.mxu0 %vm2728_vm1, %v2726_v10 }
 0xb2a   : > { %2465 = vmatpush3.bf16.msra.mxu0 %v2606_v36 }
 0xb2b   : > { %2466 = vmatprep.subr.bf16.mxu0 %v2726_v10 }
 0xb2e   : > { %2467 = vmatpush3.bf16.msra.mxu0 %v2607_v37 }
 0xb2f   : > { %2468 = vmatprep.subr.bf16.mxu0 %v2726_v10 }
 0xb32   : > { %2469 = vmatpush3.bf16.msra.mxu0 %v2608_v38 }
 0xb33   : > { %2470 = vmatprep.subr.bf16.mxu0 %v2726_v10 }
 0xb36   : > { %2471 = vmatpush3.bf16.msra.mxu0 %v2609_v39 }
 0xb37   : > { %2472 = vmatprep.subr.bf16.mxu0 %v2726_v10 }
 0xb3a   : > { %2473 = vmatpush3.bf16.msra.mxu0 %v2610_v42 }
 0xb3b   : > { %2474 = vmatprep.subr.bf16.mxu0 %v2726_v10 }
 0xb3e   : > { %2475 = vmatpush3.bf16.msra.mxu0 %v2611_v43 }
 0xb3f   : > { %2476 = vmatprep.subr.bf16.mxu0 %v2726_v10 }
 0xb42   : > { %2477 = vmatpush3.bf16.msra.mxu0 %v2612_v44 }
 0xb43   : > { %2478 = vmatprep.subr.bf16.mxu0 %v2726_v10 }
 0xb46   : > { %2479 = vmatpush3.bf16.msra.mxu0 %v2613_v29 }
 0xb47   : > { %2504 = vmatprep.subr.bf16.mxu0 %v2726_v10 }
 0xbfa   : > { %v1382_v30 = vpop.f32.mrb[16].mxu1  ;;  %v1438_v40 = vpop.f32.mrb[24].mxu0 }
 0xbfb   : > { %v2444_v41 = vpop.f32.mrb[17].mxu1  ;;  %v2450_v15 = vpop.f32.mrb[25].mxu0  ;;  %v1388_v16 = vsel %vm720_vm7, %v1382_v30, -inf  ;;  %v1444_v17 = vsel %vm720_vm7, %v1438_v40, -inf }
 0xbfc   : > { %1389 = vmax.xlane.f32.xlu1 %v1388_v16  ;;  %v1385_v18 = vpop.f32.mrb[18].mxu1  ;;  %1445 = vmax.xlane.f32.xlu0 %v1444_v17  ;;  %v1441_v19 = vpop.f32.mrb[26].mxu0  ;;  %v2270_v15 = vld [vmem:[%s3321_s2 + $0x15] ss:$0 sm:$0xff] }
 0xbfd   : > { %v2445_v20 = vpop.f32.mrb[19].mxu1  ;;  %v2451_v21 = vpop.f32.mrb[27].mxu0  ;;  %v2616_v19 = vld [vmem:[%s3306_s10] sm:$0xff]  }
 0xbfe   : > { %v2617_v20 = vld [vmem:[%s3306_s10 + $0x8] sm:$0xff]   ;;  %v2618_v21 = vld [vmem:[%s3306_s10 + $0x10] sm:$0xff]  }
 0xc89   : > { %v1390_v22 = vpop.xlane.xlu1 %1389  ;;  %v1446_v24 = vpop.xlane.xlu0 %1445 }
 0xc8a   : > { %v1391_v25 = vsub.f32 %v1382_v30, %v1390_v22  ;;  %v1447_v27 = vsub.f32 %v1438_v40, %v1446_v24  ;;  %v2269_v40 = vld [vmem:[%s3321_s2 + $0x14] ss:$0 sm:$0xff]  ;;  %v2619_v22 = vld [vmem:[%s3306_s10 + $0x18] sm:$0xff]   ;;  %v2271_v24 = vld [vmem:[%s3321_s2 + $0x16] ss:$0 sm:$0xff] }
 0xc8c   : > { %v1392_v28 = vmul.f32 1.442695, %v1391_v25  ;;  %v1448_v31 = vmul.f32 1.442695, %v1447_v27 }
 0xc8e   : > { %2640 = vpow2.f32 %v1392_v28 }
 0xc8f   : > { %2642 = vpow2.f32 %v1448_v31 }
 0xc98   : > { %v2641_v32 = vpop.eup %2640 }
 0xc99   : > { %v2643_v33 = vpop.eup %2642  ;;  %v1394_v34 = vsel %vm720_vm7, %v2641_v32, 0.0 }
 0xc9a   : > { %1395 = vadd.xlane.f32.xlu1 %v1394_v34  ;;  %v1450_v35 = vsel %vm720_vm7, %v2643_v33, 0.0 }
 0xc9b   : > { %1451 = vadd.xlane.f32.xlu0 %v1450_v35 }
 0xd27   : > { %v1396_v46 = vpop.xlane.xlu1 %1395 }
 0xd28   : > { %v1452_v45 = vpop.xlane.xlu0 %1451 }
 0xd29   : > { %2644 = vrcp.f32 %v1452_v45  ;;  %v2275_v45 = vld [vmem:[%s3321_s2 + $0x17] ss:$0 sm:$0xff] }
 0xd2a   : > { %2646 = vrcp.f32 %v1396_v46 }
 0xd33   : > { %v2645_v48 = vpop.eup %2644 }
 0xd34   : > { %v1454_v50 = vmul.f32 %v2645_v48, %v2643_v33  ;;  %v2647_v14 = vpop.eup %2646 }
 0xd35   : > { %v1398_v53 = vmul.f32 %v2647_v14, %v2641_v32 }
 0xd36   : > { %v1457_v51 = vpack.c.bf16 %v1454_v50, %v1454_v50 }
 0xd37   : > { %v1401_v23 = vpack.c.bf16 %v1398_v53, %v1398_v53 }
 0xd38   : > { %2455 = vmatmul.mubr.msk.bf16.vlgmr.msra.gmra.mrb[20].mxu1 %vm720_vm7, %v1457_v51 }
 0xd39   : > { %2459 = vmatpush3.bf16.msra.mxu1 %v1508_v52  ;;  %2460 = vmatprep.mubr.msk.bf16.mxu1 %vm2728_vm1, %v2726_v10 }
 0xd3a   : > { %2484 = vmatprep.subr.bf16.mxu1 %v2726_v10 }
 0xd44   : > { %2461 = vmatmul.mubr.msk.bf16.vlgmr.msra.gmra.mrb[20].mxu1 %vm720_vm7, %v1401_v23 }
 0xd45   : > { %2488 = vmatprep.mubr.msk.bf16.mxu1 %vm2728_vm1, %v2726_v10  ;;  %2485 = vmatpush3.bf16.msra.mxu1 %v2614_v9 }
 0xd46   : > { %2486 = vmatprep.subr.bf16.mxu1 %v2726_v10 }
 0xd49   : > { %2487 = vmatpush3.bf16.msra.mxu1 %v2615_v11 }
 0xd4a   : > { %2492 = vmatprep.subr.bf16.mxu1 %v2726_v10 }
 0xe17   : > { %v1544_v55 = vpop.f32.mrb[20].mxu1 }
 0xe18   : > { %v1550_v56 = vpack.c.bf16 %v1544_v55, %v1544_v55  ;;  %v2462_v57 = vpop.f32.mrb[21].mxu1 }
 0xe19   : > { %v1547_v58 = vpop.f32.mrb[22].mxu1  ;;  %v2621_v57 = vld [vmem:[%s3307_s11 + $0x8] sm:$0xff]  }
 0xe1a   : > { %v2463_v59 = vpop.f32.mrb[23].mxu1  ;;  %2481 = vmatmul.mubr.bf16.vlgmr.msra.gmra.mrb[28].mxu0 %v1550_v56  ;;  %v2620_v56 = vld [vmem:[%s3307_s11] sm:$0xff]  }
 0xe1b   : > { %2508 = vmatprep.mubr.msk.bf16.mxu0 %vm2728_vm1, %v2726_v10  ;;  %2505 = vmatpush3.bf16.msra.mxu0 %v2620_v56 }
 0xe1c   : > { %2506 = vmatprep.subr.bf16.mxu0 %v2726_v10 }
 0xe1f   : > { %2507 = vmatpush3.bf16.msra.mxu0 %v2621_v57 }
 0xeed   : > { %v1654_v61 = vpop.f32.mrb[28].mxu0 }
 0xeee   : > { %v1655_v62 = vadd.f32 %v2260_v60, %v1654_v61  ;;  %v2482_v63 = vpop.f32.mrb[29].mxu0 }
 0xeef   : > { %v1657_v0 = vpop.f32.mrb[30].mxu0 }
 0xef0   : > { %v2483_v1 = vpop.f32.mrb[31].mxu0  ;;  %v1660_v2 = vadd.f32 %v1655_v62, %v3069_v54  ;;  %v2281_v62 = vld [vmem:[%s3321_s2 + $0x18] ss:$0 sm:$0xff]  ;;  %v2282_v0 = vld [vmem:[%s3321_s2 + $0x19] ss:$0 sm:$0xff] }
 0xef2   : > { %v1663_v3 = vsel %vm509_vm0, %v1660_v2, 0.0 }
 0xef3   : > { %1664 = vadd.xlane.f32.xlu0 %v1663_v3 }
 0xf80   : > { %v1665_v4 = vpop.xlane.xlu0 %1664 }
 0xf81   : > { %v1666_v5 = vmul.f32 0.03125, %v1665_v4  ;;  %v2283_v4 = vld [vmem:[%s3321_s2 + $0x2] ss:$0 sm:$0xff] }
 0xf83   : > { %v1667_v6 = vsub.f32 %v1660_v2, %v1666_v5 }
 0xf85   : > { %v1668_v7 = vmul.f32 %v1667_v6, %v1667_v6 }
 0xf87   : > { %v1669_v8 = vsel %vm509_vm0, %v1668_v7, 0.0 }
 0xf88   : > { %1670 = vadd.xlane.f32.xlu1 %v1669_v8 }
0x1015   : > { %v1671_v54 = vpop.xlane.xlu1 %1670 }
0x1016   : > { %v1672_v12 = vmul.f32 0.03125, %v1671_v54 }
0x1018   : > { %v1673_v13 = vadd.f32 1e-12, %v1672_v12 }
0x101a   : > { %2648 = vrsqrt.f32 %v1673_v13 }
0x1024   : > { %v2649_v30 = vpop.eup %2648 }
0x1025   : > { %v1675_v41 = vmul.f32 %v2649_v30, %v1667_v6 }
0x1027   : > { %v1680_v16 = vmul.f32 %v2269_v40, %v1675_v41 }
0x1029   : > { %v1685_v17 = vadd.f32 %v2270_v15, %v1680_v16 }
0x102b   : > { %v1686_v18 = vpack.c.bf16 %v1685_v17, %v1685_v17 }
0x102d   : > { %2489 = vmatmul.mubr.msk.bf16.vlgmr.msra.gmra.mrb[24].mxu1 %vm509_vm0, %v1686_v18 }
0x102e   : > { %2500 = vmatprep.mubr.msk.bf16.mxu1 %vm2728_vm1, %v2726_v10  ;;  %2493 = vmatpush3.bf16.msra.mxu1 %v2616_v19 }
0x102f   : > { %2494 = vmatprep.subr.bf16.mxu1 %v2726_v10 }
0x1032   : > { %2495 = vmatpush3.bf16.msra.mxu1 %v2617_v20 }
0x1033   : > { %2496 = vmatprep.subr.bf16.mxu1 %v2726_v10 }
0x1036   : > { %2497 = vmatpush3.bf16.msra.mxu1 %v2618_v21 }
0x1037   : > { %2498 = vmatprep.subr.bf16.mxu1 %v2726_v10 }
0x103a   : > { %2499 = vmatpush3.bf16.msra.mxu1 %v2619_v22 }
0x103b   : > { %2512 = vmatprep.subr.bf16.mxu1 %v2726_v10 }
0x1100   : > { %v1745_v25 = vpop.f32.mrb[24].mxu1 }
0x1101   : > { %v1746_v27 = vadd.f32 %v2271_v24, %v1745_v25  ;;  %v2490_v28 = vpop.f32.mrb[25].mxu1  ;;  %v2622_v24 = vld [vmem:[%s3308_s12] sm:$0xff]   ;;  %v2623_v25 = vld [vmem:[%s3308_s12 + $0x8] sm:$0xff]  }
0x1102   : > { %v1748_v31 = vpop.f32.mrb[26].mxu1 }
0x1103   : > { %v1751_v32 = vmul.f32 %v1746_v27, %v1746_v27  ;;  %v2491_v33 = vpop.f32.mrb[27].mxu1 }
0x1105   : > { %v1752_v34 = vmul.f32 %v1751_v32, %v1746_v27 }
0x1107   : > { %v1753_v35 = vmul.f32 0.044715, %v1752_v34  ;;  %v2287_v34 = vld [vmem:[%s3321_s2 + $0x3] ss:$0 sm:$0xff] }
0x1109   : > { %v1754_v36 = vadd.f32 %v1753_v35, %v1746_v27 }
0x110b   : > { %v1755_v37 = vmul.f32 0.7978846, %v1754_v36  ;;  %v2288_v36 = vld [vmem:[%s3321_s2 + $0x4] ss:$0 sm:$0xff] }
0x110d   : > { %2650 = vtanh.f32 %v1755_v37 }
0x1117   : > { %v2651_v38 = vpop.eup %2650 }
0x1118   : > { %v1757_v39 = vadd.f32 1.0, %v2651_v38 }
0x111a   : > { %v1758_v42 = vmul.f32 0.5, %v1757_v39 }
0x111c   : > { %v1759_v43 = vmul.f32 %v1758_v42, %v1746_v27  ;;  %v2032_v27 = vld [vmem:[%s486_s20] sm:$0xff]  ;;  %s2295_s20 = sshll.u32 %s2826_s17, 7 }
0x111d   : > { %v2289_v42 = vld [vmem:[%s3321_s2 + $0x5] ss:$0 sm:$0xff]  ;;  %vm2050_vm10 = vcmp.ne.s32.totalorder %v2032_v27, 4294967196  ;;  %s3252_s0 = scalar_lea.hbm %s3309_s13, %s2295_s20  ;;  %s2668_s2 = scalar_lea.vmem %s2667_s1, 256 }
0x111e   : > { %v1760_v44 = vpack.c.bf16 %v1759_v43, %v1759_v43  ;;  %v2293_v57 = vsel %vm2050_vm10, 1.0, %v2726_v10  ;;  %p2670_p1 = scmp.lt.s32.totalorder %s2668_s2, %s2662_s4 }
0x1120   : > { %2501 = vmatmul.mubr.msk.bf16.vlgmr.msra.gmra.mrb[28].mxu1 %vm1132_vm8, %v1760_v44  ;;  %p2671_p2 = por %p2670_p1, %p2669_p0 }
0x1121   : > { %2516 = vmatprep.mubr.msk.bf16.mxu1 %vm2728_vm1, %v2726_v10  ;;  %2513 = vmatpush3.bf16.msra.mxu1 %v2622_v24 }
0x1122   : > { %2514 = vmatprep.subr.bf16.mxu1 %v2726_v10  ;;  %p2672_p3 = pnand %p2671_p2, %p2665_p13 }
0x1125   : > { %2515 = vmatpush3.bf16.msra.mxu1 %v2623_v25 }
0x11f3   : > { %v1835_v46 = vpop.f32.mrb[28].mxu1 }
0x11f4   : > { %v1836_v47 = vadd.f32 %v2275_v45, %v1835_v46  ;;  %v2502_v48 = vpop.f32.mrb[29].mxu1 }
0x11f5   : > { %v1838_v49 = vpop.f32.mrb[30].mxu1 }
0x11f6   : > { %v2503_v50 = vpop.f32.mrb[31].mxu1  ;;  %v1841_v51 = vadd.f32 %v1836_v47, %v1685_v17 }
0x11f8   : > { %v1844_v52 = vsel %vm509_vm0, %v1841_v51, 0.0 }
0x11f9   : > { %1845 = vadd.xlane.f32.xlu0 %v1844_v52 }
0x1286   : > { %v1846_v14 = vpop.xlane.xlu0 %1845 }
0x1287   : > { %v1847_v53 = vmul.f32 0.03125, %v1846_v14 }
0x1289   : > { %v1848_v23 = vsub.f32 %v1841_v51, %v1847_v53 }
0x128b   : > { %v1849_v29 = vmul.f32 %v1848_v23, %v1848_v23 }
0x128d   : > { %v1850_v55 = vsel %vm509_vm0, %v1849_v29, 0.0 }
0x128e   : > { %1851 = vadd.xlane.f32.xlu1 %v1850_v55 }
0x131b   : > { %v1852_v58 = vpop.xlane.xlu1 %1851 }
0x131c   : > { %v1853_v59 = vmul.f32 0.03125, %v1852_v58 }
0x131e   : > { %v1854_v60 = vadd.f32 1e-12, %v1853_v59 }
0x1320   : > { %2652 = vrsqrt.f32 %v1854_v60 }
0x132a   : > { %v2653_v61 = vpop.eup %2652 }
0x132b   : > { %v1856_v63 = vmul.f32 %v2653_v61, %v1848_v23  ;;  %v2066_v61 = vsel %vm2055_vm11, %v2293_v57, 0.0 }
0x132d   : > { %v1861_v1 = vmul.f32 %v2281_v62, %v1856_v63 }
0x132f   : > { %v1866_v2 = vadd.f32 %v2282_v0, %v1861_v1 }
0x1331   : > { %v1867_v3 = vpack.c.bf16 %v1866_v2, %v1866_v2 }
0x1333   : > { %2509 = vmatmul.mubr.msk.bf16.vlgmr.msra.gmra.mrb[32].mxu0 %vm509_vm0, %v1867_v3 }
0x1406   : > { %v1926_v5 = vpop.f32.mrb[32].mxu0 }
0x1407   : > { %v1927_v6 = vadd.f32 %v2283_v4, %v1926_v5  ;;  %v2510_v7 = vpop.f32.mrb[33].mxu0 }
0x1408   : > { %v1929_v8 = vpop.f32.mrb[34].mxu0 }
0x1409   : > { %v1932_v9 = vmul.f32 %v1927_v6, %v1927_v6  ;;  %v2511_v11 = vpop.f32.mrb[35].mxu0 }
0x140b   : > { %v1933_v54 = vmul.f32 %v1932_v9, %v1927_v6 }
0x140d   : > { %v1934_v12 = vmul.f32 0.044715, %v1933_v54 }
0x140f   : > { %v1935_v13 = vadd.f32 %v1934_v12, %v1927_v6 }
0x1411   : > { %v1936_v30 = vmul.f32 0.7978846, %v1935_v13 }
0x1413   : > { %2654 = vtanh.f32 %v1936_v30 }
0x141d   : > { %v2655_v40 = vpop.eup %2654 }
0x141e   : > { %v1938_v41 = vadd.f32 1.0, %v2655_v40 }
0x1420   : > { %v1939_v15 = vmul.f32 0.5, %v1938_v41 }
0x1422   : > { %v1940_v16 = vmul.f32 %v1939_v15, %v1927_v6 }
0x1424   : > { %v1943_v17 = vsel %vm509_vm0, %v1940_v16, 0.0 }
0x1425   : > { %1944 = vadd.xlane.f32.xlu0 %v1943_v17 }
0x14b2   : > { %v1945_v18 = vpop.xlane.xlu0 %1944 }
0x14b3   : > { %v1946_v19 = vmul.f32 0.03125, %v1945_v18 }
0x14b5   : > { %v1947_v20 = vsub.f32 %v1940_v16, %v1946_v19 }
0x14b7   : > { %v1948_v21 = vmul.f32 %v1947_v20, %v1947_v20 }
0x14b9   : > { %v1949_v22 = vsel %vm509_vm0, %v1948_v21, 0.0 }
0x14ba   : > { %1950 = vadd.xlane.f32.xlu1 %v1949_v22 }
0x14cb   : > { %2044 = vperm.xlu1 %2574, %v2032_v27  }
0x1547   : > { %v1951_v28 = vpop.xlane.xlu1 %1950 }
0x1548   : > { %v1952_v31 = vmul.f32 0.03125, %v1951_v28 }
0x154a   : > { %v1953_v32 = vadd.f32 1e-12, %v1952_v31 }
0x154b   : > { %v2045_v51 = vpop.permute.xlu1 %2044 }
0x154c   : > { %2656 = vrsqrt.f32 %v1953_v32  ;;  %vm2046_vm9 = vcmp.eq.s32.totalorder %v2906_v26, %v2045_v51 }
0x1556   : > { %v2657_v33 = vpop.eup %2656 }
0x1557   : > { %v1955_v35 = vmul.f32 %v2657_v33, %v1947_v20 }
0x1559   : > { %v1960_v37 = vmul.f32 %v2287_v34, %v1955_v35 }
0x155b   : > { %v1965_v38 = vadd.f32 %v2288_v36, %v1960_v37 }
0x155d   : > { %v1966_v39 = vpack.c.bf16 %v1965_v38, %v1965_v38 }
0x155f   : > { %2517 = vmatmul.mubr.msk.bf16.vlgmr.msra.gmra.mrb[32].mxu1 %vm509_vm0, %v1966_v39 }
0x1632   : > { %v2025_v43 = vpop.f32.mrb[32].mxu1 }
0x1633   : > { %v2026_v44 = vadd.f32 %v2289_v42, %v2025_v43  ;;  %v2518_v45 = vpop.f32.mrb[33].mxu1 }
0x1634   : > { %v2028_v46 = vpop.f32.mrb[34].mxu1 }
0x1635   : > { %2033 = vmax.xlane.f32.xlu0 %v2026_v44  ;;  %v2519_v47 = vpop.f32.mrb[35].mxu1  ;;  %2031 = vst [vmem:[%s472_s18] sm:$0xff] %v2026_v44  ;;  %v2047_v14 = vsel %vm2046_vm9, %v2026_v44, 0.0 }
0x16c2   : > { %v2034_v48 = vpop.xlane.xlu0 %2033 }
0x16c3   : > { %v2035_v49 = vsub.f32 %v2026_v44, %v2034_v48 }
0x16c5   : > { %v2036_v50 = vmul.f32 1.442695, %v2035_v49 }
0x16c7   : > { %2658 = vpow2.f32 %v2036_v50 }
0x16d1   : > { %v2659_v52 = vpop.eup %2658 }
0x16d2   : > { %2038 = vadd.xlane.f32.xlu0 %v2659_v52 }
0x16d6   : > { %2048 = vadd.xlane.f32.xlu0 %v2047_v14 }
0x175f   : > { %v2039_v53 = vpop.xlane.xlu0 %2038 }
0x1760   : > { %2660 = vlog2.f32 %v2039_v53 }
0x1763   : > { %v2049_v56 = vpop.xlane.xlu0 %2048 }
0x176a   : > { %v2661_v23 = vpop.eup %2660 }
0x176b   : > { %v2041_v29 = vmul.f32 0.6931472, %v2661_v23 }
0x176d   : > { %v2042_v55 = vadd.f32 %v2041_v29, %v2034_v48 }
0x176f   : > { %v2053_v58 = vsub.f32 %v2042_v55, %v2049_v56 }
0x1771   : > { %v2054_v59 = vmul.f32 %v2293_v57, %v2053_v58 }
0x1773   : > { %v2056_v60 = vsel %vm2055_vm11, %v2054_v59, 0.0 }
0x1774   : > { %2057 = vadd.xlane.f32.xlu0 %v2056_v60 }
0x1778   : > { %2067 = vadd.xlane.f32.xlu0 %v2066_v61 }
0x1779   : > { %2675 = shalt.err (!%p2672_p3)
}
0x177a   : > { %s2676_s17 = scalar_lea.hbm %s3252_s0, 128  ;;  %s2680_s20 = scalar_lea.hbm %s3309_s13, 256 }
0x177b   : > { %p2677_p4 = scmp.ne.s32.totalorder %s3252_s0, %s2676_s17  ;;  %p2681_p9 = scmp.lt.u32.totalorder %s3252_s0, %s3309_s13 }
0x177c   : > { %p2682_p10 = scmp.lt.u32.totalorder %s2680_s20, %s2676_s17  ;;  %p2684_p12 = scmp.lt.u32.totalorder %s2676_s17, %s3252_s0 }
0x177d   : > { %p2678_p7 = pnand %p2677_p4, %p2843_p5 }
0x177e   : > { %p2683_p11 = por %p2682_p10, %p2681_p9 }
0x177f   : > { %p2679_p8 = pneg %p2678_p7 }
0x1780   : > { %p2685_p13 = por %p2684_p12, %p2683_p11 }
0x1782   : > { %p2686_p0 = pnand %p2685_p13, %p2679_p8 }
0x1784   : > { %2689 = shalt.err (!%p2686_p0)
}
0x1785   : > { %2532 = dma.vmem_to_hbm [thread:$0]  (%p2843_p5), %s2102_s21, 128, %s3252_s0, %s2084_s3   ;;  %vm2077_vm12 = vcmp.eq.s32.totalorder %v2906_v26, 1  ;;  %vm2076_vm13 = vcmp.eq.s32.totalorder %v2906_v26, 0 }
0x1786   : > { %s490_s0 = scalar_lea.vmem %s3310_s14, %s2855_s26 }
0x1801   : > { %v2058_v10 = vpop.xlane.xlu0 %2057 }
0x1802   : > { %v2059_v62 = vrot.slane %v2058_v10, 4 }
0x1804   : > { %v2060_v63 = vadd.f32 %v2059_v62, %v2058_v10 }
0x1805   : > { %v2068_v0 = vpop.xlane.xlu0 %2067 }
0x1806   : > { %v2061_v1 = vrot.slane %v2060_v63, 2  ;;  %v2069_v2 = vrot.slane %v2068_v0, 4 }
0x1808   : > { %v2070_v3 = vadd.f32 %v2069_v2, %v2068_v0  ;;  %v2062_v4 = vadd.f32 %v2061_v1, %v2060_v63 }
0x180a   : > { %v2071_v5 = vrot.slane %v2070_v3, 2  ;;  %v2063_v6 = vrot.slane %v2062_v4, 1 }
0x180c   : > { %v2072_v7 = vadd.f32 %v2071_v5, %v2070_v3  ;;  %v2064_v8 = vadd.f32 %v2063_v6, %v2062_v4 }
0x180e   : > { %2528 = vpush %v2064_v8  ;;  %v2073_v9 = vrot.slane %v2072_v7, 1 }
0x1810   : > { %v2074_v11 = vadd.f32 %v2073_v9, %v2072_v7 }
0x1812   : > { %2530 = vpush %v2074_v11 }
0x183f   : > { %s2529_s2 = spop %2528 }
0x1840   : > { %v2080_v12 = vstv %s2529_s2 }
0x1843   : > { %s2531_s23 = spop %2530 }
0x1844   : > { %v2078_v54 = vstv %s2531_s23 }
0x1845   : > { %v2079_v13 = vsel %vm2077_vm12, %v2078_v54, 0.0 }
0x1846   : > { %v2081_v30 = vsel %vm2076_vm13, %v2080_v12, %v2079_v13 }
0x1847   : > { %2082 = vst [vmem:[%s490_s0] sm:$0xff] %v2081_v30 }
0x1848 PF: > { %p2538_p5 = scmp.ge.s32.totalorder %s2724_s16, 2  ;;  %s2116_s3 = sand.u32 1, %s2712_s29  }
0x1849   : > { %s2117_s4 = scalar_lea.sflag [#allocation3], %s2116_s3 }
0x184a   : > { %p2535_p1 = pnand %p2538_p5, %p2847_p6 }
0x184c   : > { %2707 = dma.done.wait (!%p2535_p1), %s2117_s4, 128  }
0x184d   : > { %2709 = vsyncadd (!%p2535_p1), %s2117_s4, 4294967168  ;;  %s3324_s26 = sld [smem:[#allocation5_spill]]  ;;  %p25_p2 = scmp.ge.s32.totalorder %s2830_s19, 4  }
0x184e   : > { %s3325_s29 = smov %s2716_s30  ;;  %s3326_s30 = smov %s2720_s15 }
0x184f   : > { %s3328_s16 = smov %s2830_s19  ;;  %27 = sbr.rel (!%p25_p2) target bundleno = 9 (0x9), region = 122 }
0x1853   : > { %s3327_s15 = smov %s3324_s26 }
0x1856   :  { %2129 = vsyncpa [#allocation3], 1 }
0x1857   :  { %2131 = vsyncpa [#allocation3 + $0x1], 1 }

</bundles_post_ra>
